<compile_context>
chip_gen: v7x
topology: tpu7x:2x2x1
jax: 0.10.0
libtpu: 0.0.40
codegen_flags: <defaults>
</compile_context>

<pallas_src>
import math

import jax
import jax.numpy as jnp
from jax import lax
from jax.experimental import pallas as pl
from jax.experimental.pallas import tpu as pltpu


# ----------------------------- config ---------------------------------------
B = 2            # batch
S = 8            # max_text_words (sequence length)
D = 32           # hidden size
H = 2            # attention heads
DH = D // H      # head dim
DI = 64          # intermediate (FFN) size
NLAYERS = 2
VOCAB = 100
MAX_POS = 64
LN_EPS = 1e-12
BS = B * S


# --------------------------- in-kernel helpers -------------------------------
def _layer_norm(x, gamma, beta):
    mean = jnp.mean(x, axis=-1, keepdims=True)
    centered = x - mean
    var = jnp.mean(centered * centered, axis=-1, keepdims=True)
    inv = lax.rsqrt(var + LN_EPS)
    return centered * inv * gamma + beta


def _softmax_rows(s):
    # Exact division (review: approx reciprocal saves nothing at this size).
    s = s - jnp.max(s, axis=-1, keepdims=True)
    p = jnp.exp(s)
    return p / jnp.sum(p, axis=-1, keepdims=True)


# ----------------------------- fused kernel ----------------------------------
def bert_fused_kernel(ids_ref, mask_ref,
                      wemb_ref, pos_ref, typ_ref,
                      emb_g_ref, emb_b_ref,
                      wqkv_ref, bqkv_ref,
                      wo_ref, bo_ref,
                      ln1_g_ref, ln1_b_ref,
                      wi_ref, bi_ref,
                      wd_ref, bd_ref,
                      ln2_g_ref, ln2_b_ref,
                      pw_ref, pb_ref,
                      hid_out_ref, pool_out_ref):
    # ---- fused embeddings ----------------------------------------------------
    # Word-embedding gather as a one-hot matmul on the MXU (exact: 1.0 * row).
    ids = ids_ref[...]                                           # (BS, 1) int32
    vocab_iota = lax.broadcasted_iota(jnp.int32, (BS, VOCAB), 1)
    onehot = (vocab_iota == ids).astype(jnp.float32)             # (BS, VOCAB)
    word = jnp.dot(onehot, wemb_ref[...],
                   preferred_element_type=jnp.float32)           # (BS, D)
    # position_ids = arange(S) per row -> tile the (S, D) slab over batch.
    # token_type_ids = 0 -> single broadcast row.
    emb = word + jnp.tile(pos_ref[...], (B, 1)) + typ_ref[...]
    hidden = _layer_norm(emb, emb_g_ref[...], emb_b_ref[...])    # (BS, D) f32

    # Additive attention bias, duplicated across heads (head-major batch order).
    bias = (1.0 - mask_ref[...]) * -10000.0                      # (B, S)
    bias_hb = jnp.concatenate([bias] * H, axis=0)                # (H*B, S)

    for li in range(NLAYERS):
        # Fused QKV projection: one (BS, D) @ (D, 3D) matmul.
        # (1/sqrt(DH) is folded into the Q columns of wqkv at init time.)
        qkv = jnp.dot(hidden, wqkv_ref[li],
                      preferred_element_type=jnp.float32) + bqkv_ref[li]
        q3 = qkv[:, 0 * D:1 * D].reshape(B, S, D)
        k3 = qkv[:, 1 * D:2 * D].reshape(B, S, D)
        v3 = qkv[:, 2 * D:3 * D].reshape(B, S, D)

        # Pack heads into the batch dim via leading-dim concat (no transposes):
        # order is [h0b0, h0b1, h1b0, h1b1] -> (H*B, S, DH).
        q_bh = jnp.concatenate([q3[:, :, h * DH:(h + 1) * DH] for h in range(H)], axis=0)
        k_bh = jnp.concatenate([k3[:, :, h * DH:(h + 1) * DH] for h in range(H)], axis=0)
        v_bh = jnp.concatenate([v3[:, :, h * DH:(h + 1) * DH] for h in range(H)], axis=0)

        # One batched QK^T, one softmax, one batched P@V per layer.
        s = jnp.einsum('nqd,nkd->nqk', q_bh, k_bh,
                       preferred_element_type=jnp.float32)       # (H*B, S, S)
        p = _softmax_rows(s + bias_hb[:, None, :])
        ctx_bh = jnp.einsum('nqk,nkd->nqd', p, v_bh,
                            preferred_element_type=jnp.float32)  # (H*B, S, DH)

        # Reassemble (BS, D) context in registers (no VMEM scratch round-trip).
        ctx = jnp.concatenate(
            [ctx_bh[h * B:(h + 1) * B].reshape(BS, DH) for h in range(H)],
            axis=-1)                                             # (BS, D)

        attn = jnp.dot(ctx, wo_ref[li],
                       preferred_element_type=jnp.float32) + bo_ref[li]
        h1 = _layer_norm(hidden + attn, ln1_g_ref[li], ln1_b_ref[li])

        # FFN.  TODO(synk): HF BERT uses exact erf-GELU; tanh approximation here.
        ff = jnp.dot(h1, wi_ref[li],
                     preferred_element_type=jnp.float32) + bi_ref[li]
        ff = jax.nn.gelu(ff, approximate=True)
        ff = jnp.dot(ff, wd_ref[li],
                     preferred_element_type=jnp.float32) + bd_ref[li]

        hidden = _layer_norm(h1 + ff, ln2_g_ref[li], ln2_b_ref[li])

    # last_hidden_state written exactly once as a (BS, D) slab.
    hid_out_ref[...] = hidden

    # Pooler on the B CLS rows only: tanh(cls @ Wp + bp), single store.
    cls = jnp.concatenate([hidden[b * S:b * S + 1, :] for b in range(B)], axis=0)
    pool_out_ref[...] = jnp.tanh(
        jnp.dot(cls, pw_ref[...], preferred_element_type=jnp.float32) + pb_ref[...])


# ----------------------------- wrapper ----------------------------------------
def _full_spec(shape):
    zeros = (0,) * len(shape)
    return pl.BlockSpec(shape, lambda i, _z=zeros: _z)


def bert_forward_fused(ids, mask_f, pos_slab, type_row, p):
    inputs = [
        ids, mask_f,
        p["word_emb"], pos_slab, type_row,
        p["emb_ln_g"], p["emb_ln_b"],
        p["wqkv"], p["bqkv"], p["wo"], p["bo"],
        p["ln1_g"], p["ln1_b"], p["wi"], p["bi"],
        p["wd"], p["bd"], p["ln2_g"], p["ln2_b"],
        p["pool_w"], p["pool_b"],
    ]
    hid, pooled = pl.pallas_call(
        bert_fused_kernel,
        out_shape=(jax.ShapeDtypeStruct((BS, D), jnp.float32),
                   jax.ShapeDtypeStruct((B, D), jnp.float32)),
        grid=(1,),
        in_specs=[_full_spec(x.shape) for x in inputs],
        out_specs=(_full_spec((BS, D)), _full_spec((B, D))),
        compiler_params=pltpu.CompilerParams(
            dimension_semantics=("arbitrary",)),
    )(*inputs)
    return hid, pooled


# ----------------------------- parameters ------------------------------------
def init_params(key):
    def dense(k, din, dout):
        # f32 weights (matches the PyTorch reference; this kernel is latency-,
        # not MXU-throughput-bound, so bf16 buys nothing here).
        return 0.02 * jax.random.normal(k, (din, dout), jnp.float32)

    keys = jax.random.split(key, 4 + NLAYERS)
    params = {
        "word_emb": 0.02 * jax.random.normal(keys[0], (VOCAB, D), jnp.float32),
        "pos_emb": 0.02 * jax.random.normal(keys[1], (MAX_POS, D), jnp.float32),
        "type_emb": 0.02 * jax.random.normal(keys[2], (2, D), jnp.float32),
        "emb_ln_g": jnp.ones((1, D), jnp.float32),
        "emb_ln_b": jnp.zeros((1, D), jnp.float32),
        "pool_w": dense(keys[3], D, D),
        "pool_b": jnp.zeros((1, D), jnp.float32),
    }

    attn_scale = 1.0 / math.sqrt(DH)
    wqkv, bqkv, wo, bo = [], [], [], []
    ln1_g, ln1_b, wi, bi, wd, bd, ln2_g, ln2_b = [], [], [], [], [], [], [], []
    for li in range(NLAYERS):
        lkeys = jax.random.split(keys[4 + li], 6)
        # Fold the 1/sqrt(DH) attention scale into Wq (q bias is zero).
        wq = dense(lkeys[0], D, D) * attn_scale
        wk = dense(lkeys[1], D, D)
        wv = dense(lkeys[2], D, D)
        wqkv.append(jnp.concatenate([wq, wk, wv], axis=1))        # (D, 3D)
        bqkv.append(jnp.zeros((1, 3 * D), jnp.float32))
        wo.append(dense(lkeys[3], D, D))
        bo.append(jnp.zeros((1, D), jnp.float32))
        ln1_g.append(jnp.ones((1, D), jnp.float32))
        ln1_b.append(jnp.zeros((1, D), jnp.float32))
        wi.append(dense(lkeys[4], D, DI))
        bi.append(jnp.zeros((1, DI), jnp.float32))
        wd.append(dense(lkeys[5], DI, D))
        bd.append(jnp.zeros((1, D), jnp.float32))
        ln2_g.append(jnp.ones((1, D), jnp.float32))
        ln2_b.append(jnp.zeros((1, D), jnp.float32))

    params.update({
        "wqkv": jnp.stack(wqkv), "bqkv": jnp.stack(bqkv),
        "wo": jnp.stack(wo), "bo": jnp.stack(bo),
        "ln1_g": jnp.stack(ln1_g), "ln1_b": jnp.stack(ln1_b),
        "wi": jnp.stack(wi), "bi": jnp.stack(bi),
        "wd": jnp.stack(wd), "bd": jnp.stack(bd),
        "ln2_g": jnp.stack(ln2_g), "ln2_b": jnp.stack(ln2_b),
    })
    return params


# ----------------------------- forward ---------------------------------------
@jax.jit
def text_bert_encoding_forward(params, bert_caps, cap_mask):
    """Mirrors Text_bert_encoding.forward: text = (bert_caps, cap_mask).

    token_type_ids are all zeros; position_ids are arange(S) per batch row
    (same as the torch.full / torch.stack construction in the reference).
    The embedding gathers/sums happen inside the fused kernel.
    """
    batch_size, max_text_words = bert_caps.shape
    assert (batch_size, max_text_words) == (B, S)

    ids = bert_caps.astype(jnp.int32).reshape(BS, 1)     # token ids for in-kernel gather
    mask_f = cap_mask.astype(jnp.float32)                # (B, S)
    pos_slab = params["pos_emb"][:S]                     # position_ids = arange(S)
    type_row = params["type_emb"][0:1]                   # token_type_ids = 0

    hid, pooled = bert_forward_fused(ids, mask_f, pos_slab, type_row, params)

    return {"last_hidden_state": hid.reshape(B, S, D), "pooler_output": pooled}


# ----------------------------- main -------------------------------------------
if __name__ == "__main__":
    root = jax.random.PRNGKey(0)
    k_params, k_ids = jax.random.split(root)

    params = init_params(k_params)

    bert_caps = jax.random.randint(k_ids, (B, S), 0, VOCAB, dtype=jnp.int32)
    lengths = jnp.array([S, 5], jnp.int32)
    cap_mask = (jnp.arange(S)[None, :] < lengths[:, None]).astype(jnp.int32)

    out = text_bert_encoding_forward(params, bert_caps, cap_mask)
    jax.block_until_ready(out)

    assert out["last_hidden_state"].shape == (B, S, D)
    assert out["pooler_output"].shape == (B, D)
    print("KERNEL_OK")
</pallas_src>

<mosaic_0001>
module attributes {stable_mosaic.version = 11 : i64} {
  func.func @bert_fused_kernel(%arg0: i32, %arg1: memref<16x1xi32, #tpu.memory_space<vmem>>, %arg2: memref<2x8xf32, #tpu.memory_space<vmem>>, %arg3: memref<100x32xf32, #tpu.memory_space<vmem>>, %arg4: memref<8x32xf32, #tpu.memory_space<vmem>>, %arg5: memref<1x32xf32, #tpu.memory_space<vmem>>, %arg6: memref<1x32xf32, #tpu.memory_space<vmem>>, %arg7: memref<1x32xf32, #tpu.memory_space<vmem>>, %arg8: memref<2x32x96xf32, #tpu.memory_space<vmem>>, %arg9: memref<2x1x96xf32, #tpu.memory_space<vmem>>, %arg10: memref<2x32x32xf32, #tpu.memory_space<vmem>>, %arg11: memref<2x1x32xf32, #tpu.memory_space<vmem>>, %arg12: memref<2x1x32xf32, #tpu.memory_space<vmem>>, %arg13: memref<2x1x32xf32, #tpu.memory_space<vmem>>, %arg14: memref<2x32x64xf32, #tpu.memory_space<vmem>>, %arg15: memref<2x1x64xf32, #tpu.memory_space<vmem>>, %arg16: memref<2x64x32xf32, #tpu.memory_space<vmem>>, %arg17: memref<2x1x32xf32, #tpu.memory_space<vmem>>, %arg18: memref<2x1x32xf32, #tpu.memory_space<vmem>>, %arg19: memref<2x1x32xf32, #tpu.memory_space<vmem>>, %arg20: memref<32x32xf32, #tpu.memory_space<vmem>>, %arg21: memref<1x32xf32, #tpu.memory_space<vmem>>, %arg22: memref<16x32xf32, #tpu.memory_space<vmem>>, %arg23: memref<2x32xf32, #tpu.memory_space<vmem>>) attributes {dimension_semantics = [#tpu.dimension_semantics<arbitrary>], iteration_bounds = array<i64: 1>, scalar_prefetch = 0 : i64, scratch_operands = 0 : i64, tpu.core_type = #tpu.core_type<tc>, window_params = [{pipeline_mode = #tpu.pipeline_mode<synchronous>, transform_indices = @transform_0, window_bounds = array<i64: 16, 1>}, {pipeline_mode = #tpu.pipeline_mode<synchronous>, transform_indices = @transform_1, window_bounds = array<i64: 2, 8>}, {pipeline_mode = #tpu.pipeline_mode<synchronous>, transform_indices = @transform_2, window_bounds = array<i64: 100, 32>}, {pipeline_mode = #tpu.pipeline_mode<synchronous>, transform_indices = @transform_3, window_bounds = array<i64: 8, 32>}, {pipeline_mode = #tpu.pipeline_mode<synchronous>, transform_indices = @transform_4, window_bounds = array<i64: 1, 32>}, {pipeline_mode = #tpu.pipeline_mode<synchronous>, transform_indices = @transform_5, window_bounds = array<i64: 1, 32>}, {pipeline_mode = #tpu.pipeline_mode<synchronous>, transform_indices = @transform_6, window_bounds = array<i64: 1, 32>}, {pipeline_mode = #tpu.pipeline_mode<synchronous>, transform_indices = @transform_7, window_bounds = array<i64: 2, 32, 96>}, {pipeline_mode = #tpu.pipeline_mode<synchronous>, transform_indices = @transform_8, window_bounds = array<i64: 2, 1, 96>}, {pipeline_mode = #tpu.pipeline_mode<synchronous>, transform_indices = @transform_9, window_bounds = array<i64: 2, 32, 32>}, {pipeline_mode = #tpu.pipeline_mode<synchronous>, transform_indices = @transform_10, window_bounds = array<i64: 2, 1, 32>}, {pipeline_mode = #tpu.pipeline_mode<synchronous>, transform_indices = @transform_11, window_bounds = array<i64: 2, 1, 32>}, {pipeline_mode = #tpu.pipeline_mode<synchronous>, transform_indices = @transform_12, window_bounds = array<i64: 2, 1, 32>}, {pipeline_mode = #tpu.pipeline_mode<synchronous>, transform_indices = @transform_13, window_bounds = array<i64: 2, 32, 64>}, {pipeline_mode = #tpu.pipeline_mode<synchronous>, transform_indices = @transform_14, window_bounds = array<i64: 2, 1, 64>}, {pipeline_mode = #tpu.pipeline_mode<synchronous>, transform_indices = @transform_15, window_bounds = array<i64: 2, 64, 32>}, {pipeline_mode = #tpu.pipeline_mode<synchronous>, transform_indices = @transform_16, window_bounds = array<i64: 2, 1, 32>}, {pipeline_mode = #tpu.pipeline_mode<synchronous>, transform_indices = @transform_17, window_bounds = array<i64: 2, 1, 32>}, {pipeline_mode = #tpu.pipeline_mode<synchronous>, transform_indices = @transform_18, window_bounds = array<i64: 2, 1, 32>}, {pipeline_mode = #tpu.pipeline_mode<synchronous>, transform_indices = @transform_19, window_bounds = array<i64: 32, 32>}, {pipeline_mode = #tpu.pipeline_mode<synchronous>, transform_indices = @transform_20, window_bounds = array<i64: 1, 32>}, {pipeline_mode = #tpu.pipeline_mode<synchronous>, transform_indices = @transform_21, window_bounds = array<i64: 16, 32>}, {pipeline_mode = #tpu.pipeline_mode<synchronous>, transform_indices = @transform_22, window_bounds = array<i64: 2, 32>}]} {
    %c0 = arith.constant 0 : index
    %c0_0 = arith.constant 0 : index
    %0 = vector.load %arg1[%c0, %c0_0] : memref<16x1xi32, #tpu.memory_space<vmem>>, vector<16x1xi32>
    %1 = tpu.iota {dimensions = array<i32: 1>} : vector<16x100xi32>
    %2 = vector.broadcast %0 : vector<16x1xi32> to vector<16x100xi32>
    %3 = arith.cmpi eq, %1, %2 : vector<16x100xi32>
    %4 = arith.extui %3 : vector<16x100xi1> to vector<16x100xi32>
    %5 = arith.sitofp %4 : vector<16x100xi32> to vector<16x100xf32>
    %c0_1 = arith.constant 0 : index
    %c0_2 = arith.constant 0 : index
    %6 = vector.load %arg3[%c0_1, %c0_2] : memref<100x32xf32, #tpu.memory_space<vmem>>, vector<100x32xf32>
    %cst = arith.constant dense<0.000000e+00> : vector<16x32xf32>
    %7 = tpu.matmul %5, %6, %cst {dimension_numbers = #tpu.dot_dimension_numbers<[1], [0], [0], [1], [0, 0, 1, 1], [], []>} : vector<16x100xf32>, vector<100x32xf32>, vector<16x32xf32> -> vector<16x32xf32>
    %c0_3 = arith.constant 0 : index
    %c0_4 = arith.constant 0 : index
    %8 = vector.load %arg4[%c0_3, %c0_4] : memref<8x32xf32, #tpu.memory_space<vmem>>, vector<8x32xf32>
    %9 = tpu.concatenate %8, %8 in 0 : vector<8x32xf32>, vector<8x32xf32> -> vector<16x32xf32>
    %10 = arith.addf %7, %9 : vector<16x32xf32>
    %c0_5 = arith.constant 0 : index
    %c0_6 = arith.constant 0 : index
    %11 = vector.load %arg5[%c0_5, %c0_6] : memref<1x32xf32, #tpu.memory_space<vmem>>, vector<1x32xf32>
    %12 = vector.broadcast %11 : vector<1x32xf32> to vector<16x32xf32>
    %13 = arith.addf %10, %12 : vector<16x32xf32>
    %c0_7 = arith.constant 0 : index
    %c0_8 = arith.constant 0 : index
    %14 = vector.load %arg6[%c0_7, %c0_8] : memref<1x32xf32, #tpu.memory_space<vmem>>, vector<1x32xf32>
    %c0_9 = arith.constant 0 : index
    %c0_10 = arith.constant 0 : index
    %15 = vector.load %arg7[%c0_9, %c0_10] : memref<1x32xf32, #tpu.memory_space<vmem>>, vector<1x32xf32>
    %cst_11 = arith.constant dense<0.000000e+00> : vector<16xf32>
    %16 = vector.multi_reduction <add>, %13, %cst_11 [1] : vector<16x32xf32> to vector<16xf32>
    %17 = vector.shape_cast %16 : vector<16xf32> to vector<16x1xf32>
    %cst_12 = arith.constant 3.200000e+01 : f32
    %18 = vector.broadcast %cst_12 : f32 to vector<16x1xf32>
    %19 = arith.divf %17, %18 : vector<16x1xf32>
    %20 = vector.broadcast %19 : vector<16x1xf32> to vector<16x32xf32>
    %21 = arith.subf %13, %20 : vector<16x32xf32>
    %22 = arith.mulf %21, %21 : vector<16x32xf32>
    %cst_13 = arith.constant dense<0.000000e+00> : vector<16xf32>
    %23 = vector.multi_reduction <add>, %22, %cst_13 [1] : vector<16x32xf32> to vector<16xf32>
    %24 = vector.shape_cast %23 : vector<16xf32> to vector<16x1xf32>
    %cst_14 = arith.constant 3.200000e+01 : f32
    %25 = vector.broadcast %cst_14 : f32 to vector<16x1xf32>
    %26 = arith.divf %24, %25 : vector<16x1xf32>
    %cst_15 = arith.constant 9.99999996E-13 : f32
    %27 = vector.broadcast %cst_15 : f32 to vector<16x1xf32>
    %28 = arith.addf %26, %27 : vector<16x1xf32>
    %29 = math.rsqrt %28 : vector<16x1xf32>
    %30 = vector.broadcast %29 : vector<16x1xf32> to vector<16x32xf32>
    %31 = arith.mulf %21, %30 : vector<16x32xf32>
    %32 = vector.broadcast %14 : vector<1x32xf32> to vector<16x32xf32>
    %33 = arith.mulf %31, %32 : vector<16x32xf32>
    %34 = vector.broadcast %15 : vector<1x32xf32> to vector<16x32xf32>
    %35 = arith.addf %33, %34 : vector<16x32xf32>
    %c0_16 = arith.constant 0 : index
    %c0_17 = arith.constant 0 : index
    %36 = vector.load %arg2[%c0_16, %c0_17] : memref<2x8xf32, #tpu.memory_space<vmem>>, vector<2x8xf32>
    %cst_18 = arith.constant 1.000000e+00 : f32
    %37 = vector.broadcast %cst_18 : f32 to vector<2x8xf32>
    %38 = arith.subf %37, %36 : vector<2x8xf32>
    %cst_19 = arith.constant -1.000000e+04 : f32
    %39 = vector.broadcast %cst_19 : f32 to vector<2x8xf32>
    %40 = arith.mulf %38, %39 : vector<2x8xf32>
    %41 = tpu.concatenate %40, %40 in 0 : vector<2x8xf32>, vector<2x8xf32> -> vector<4x8xf32>
    %c0_20 = arith.constant 0 : index
    %c0_21 = arith.constant 0 : index
    %c0_22 = arith.constant 0 : index
    %42 = vector.load %arg8[%c0_20, %c0_21, %c0_22] : memref<2x32x96xf32, #tpu.memory_space<vmem>>, vector<1x32x96xf32>
    %43 = vector.shape_cast %42 : vector<1x32x96xf32> to vector<32x96xf32>
    %cst_23 = arith.constant dense<0.000000e+00> : vector<16x96xf32>
    %44 = tpu.matmul %35, %43, %cst_23 {dimension_numbers = #tpu.dot_dimension_numbers<[1], [0], [0], [1], [0, 0, 1, 1], [], []>} : vector<16x32xf32>, vector<32x96xf32>, vector<16x96xf32> -> vector<16x96xf32>
    %c0_24 = arith.constant 0 : index
    %c0_25 = arith.constant 0 : index
    %c0_26 = arith.constant 0 : index
    %45 = vector.load %arg9[%c0_24, %c0_25, %c0_26] : memref<2x1x96xf32, #tpu.memory_space<vmem>>, vector<1x1x96xf32>
    %46 = vector.shape_cast %45 : vector<1x1x96xf32> to vector<1x96xf32>
    %47 = vector.broadcast %46 : vector<1x96xf32> to vector<16x96xf32>
    %48 = arith.addf %44, %47 : vector<16x96xf32>
    %49 = vector.extract_strided_slice %48 {offsets = [0, 0], sizes = [16, 32], strides = [1, 1]} : vector<16x96xf32> to vector<16x32xf32>
    %50 = vector.shape_cast %49 : vector<16x32xf32> to vector<2x8x32xf32>
    %51 = vector.extract_strided_slice %48 {offsets = [0, 32], sizes = [16, 32], strides = [1, 1]} : vector<16x96xf32> to vector<16x32xf32>
    %52 = vector.shape_cast %51 : vector<16x32xf32> to vector<2x8x32xf32>
    %53 = vector.extract_strided_slice %48 {offsets = [0, 64], sizes = [16, 32], strides = [1, 1]} : vector<16x96xf32> to vector<16x32xf32>
    %54 = vector.shape_cast %53 : vector<16x32xf32> to vector<2x8x32xf32>
    %55 = vector.extract_strided_slice %50 {offsets = [0, 0, 0], sizes = [2, 8, 16], strides = [1, 1, 1]} : vector<2x8x32xf32> to vector<2x8x16xf32>
    %56 = vector.extract_strided_slice %50 {offsets = [0, 0, 16], sizes = [2, 8, 16], strides = [1, 1, 1]} : vector<2x8x32xf32> to vector<2x8x16xf32>
    %57 = tpu.concatenate %55, %56 in 0 : vector<2x8x16xf32>, vector<2x8x16xf32> -> vector<4x8x16xf32>
    %58 = vector.extract_strided_slice %52 {offsets = [0, 0, 0], sizes = [2, 8, 16], strides = [1, 1, 1]} : vector<2x8x32xf32> to vector<2x8x16xf32>
    %59 = vector.extract_strided_slice %52 {offsets = [0, 0, 16], sizes = [2, 8, 16], strides = [1, 1, 1]} : vector<2x8x32xf32> to vector<2x8x16xf32>
    %60 = tpu.concatenate %58, %59 in 0 : vector<2x8x16xf32>, vector<2x8x16xf32> -> vector<4x8x16xf32>
    %61 = vector.extract_strided_slice %54 {offsets = [0, 0, 0], sizes = [2, 8, 16], strides = [1, 1, 1]} : vector<2x8x32xf32> to vector<2x8x16xf32>
    %62 = vector.extract_strided_slice %54 {offsets = [0, 0, 16], sizes = [2, 8, 16], strides = [1, 1, 1]} : vector<2x8x32xf32> to vector<2x8x16xf32>
    %63 = tpu.concatenate %61, %62 in 0 : vector<2x8x16xf32>, vector<2x8x16xf32> -> vector<4x8x16xf32>
    "tpu.trace_start"() <{level = 10 : i32, message = "nqd,nkd->nqk"}> : () -> ()
    %cst_27 = arith.constant dense<0.000000e+00> : vector<4x8x8xf32>
    %64 = tpu.matmul %57, %60, %cst_27 {dimension_numbers = #tpu.dot_dimension_numbers<[2], [2], [1], [1], [0, 0, 0, 1, 1, 1], [0], [0]>} : vector<4x8x16xf32>, vector<4x8x16xf32>, vector<4x8x8xf32> -> vector<4x8x8xf32>
    "tpu.trace_stop"() : () -> ()
    %65 = vector.shape_cast %41 : vector<4x8xf32> to vector<4x1x8xf32>
    %66 = vector.broadcast %65 : vector<4x1x8xf32> to vector<4x8x8xf32>
    %67 = arith.addf %64, %66 : vector<4x8x8xf32>
    %cst_28 = arith.constant dense<0xFF800000> : vector<4x8xf32>
    %68 = vector.multi_reduction <maximumf>, %67, %cst_28 [2] : vector<4x8x8xf32> to vector<4x8xf32>
    %69 = vector.shape_cast %68 : vector<4x8xf32> to vector<4x8x1xf32>
    %70 = vector.broadcast %69 : vector<4x8x1xf32> to vector<4x8x8xf32>
    %71 = arith.subf %67, %70 : vector<4x8x8xf32>
    %72 = math.exp %71 : vector<4x8x8xf32>
    %cst_29 = arith.constant dense<0.000000e+00> : vector<4x8xf32>
    %73 = vector.multi_reduction <add>, %72, %cst_29 [2] : vector<4x8x8xf32> to vector<4x8xf32>
    %74 = vector.shape_cast %73 : vector<4x8xf32> to vector<4x8x1xf32>
    %75 = vector.broadcast %74 : vector<4x8x1xf32> to vector<4x8x8xf32>
    %76 = arith.divf %72, %75 : vector<4x8x8xf32>
    "tpu.trace_start"() <{level = 10 : i32, message = "nqk,nkd->nqd"}> : () -> ()
    %cst_30 = arith.constant dense<0.000000e+00> : vector<4x8x16xf32>
    %77 = tpu.matmul %76, %63, %cst_30 {dimension_numbers = #tpu.dot_dimension_numbers<[2], [1], [1], [2], [0, 0, 0, 1, 1, 2], [0], [0]>} : vector<4x8x8xf32>, vector<4x8x16xf32>, vector<4x8x16xf32> -> vector<4x8x16xf32>
    "tpu.trace_stop"() : () -> ()
    %78 = vector.extract_strided_slice %77 {offsets = [0, 0, 0], sizes = [2, 8, 16], strides = [1, 1, 1]} : vector<4x8x16xf32> to vector<2x8x16xf32>
    %79 = vector.shape_cast %78 : vector<2x8x16xf32> to vector<16x16xf32>
    %80 = vector.extract_strided_slice %77 {offsets = [2, 0, 0], sizes = [2, 8, 16], strides = [1, 1, 1]} : vector<4x8x16xf32> to vector<2x8x16xf32>
    %81 = vector.shape_cast %80 : vector<2x8x16xf32> to vector<16x16xf32>
    %82 = tpu.concatenate %79, %81 in 1 : vector<16x16xf32>, vector<16x16xf32> -> vector<16x32xf32>
    %c0_31 = arith.constant 0 : index
    %c0_32 = arith.constant 0 : index
    %c0_33 = arith.constant 0 : index
    %83 = vector.load %arg10[%c0_31, %c0_32, %c0_33] : memref<2x32x32xf32, #tpu.memory_space<vmem>>, vector<1x32x32xf32>
    %84 = vector.shape_cast %83 : vector<1x32x32xf32> to vector<32x32xf32>
    %cst_34 = arith.constant dense<0.000000e+00> : vector<16x32xf32>
    %85 = tpu.matmul %82, %84, %cst_34 {dimension_numbers = #tpu.dot_dimension_numbers<[1], [0], [0], [1], [0, 0, 1, 1], [], []>} : vector<16x32xf32>, vector<32x32xf32>, vector<16x32xf32> -> vector<16x32xf32>
    %c0_35 = arith.constant 0 : index
    %c0_36 = arith.constant 0 : index
    %c0_37 = arith.constant 0 : index
    %86 = vector.load %arg11[%c0_35, %c0_36, %c0_37] : memref<2x1x32xf32, #tpu.memory_space<vmem>>, vector<1x1x32xf32>
    %87 = vector.shape_cast %86 : vector<1x1x32xf32> to vector<1x32xf32>
    %88 = vector.broadcast %87 : vector<1x32xf32> to vector<16x32xf32>
    %89 = arith.addf %85, %88 : vector<16x32xf32>
    %90 = arith.addf %35, %89 : vector<16x32xf32>
    %c0_38 = arith.constant 0 : index
    %c0_39 = arith.constant 0 : index
    %c0_40 = arith.constant 0 : index
    %91 = vector.load %arg12[%c0_38, %c0_39, %c0_40] : memref<2x1x32xf32, #tpu.memory_space<vmem>>, vector<1x1x32xf32>
    %92 = vector.shape_cast %91 : vector<1x1x32xf32> to vector<1x32xf32>
    %c0_41 = arith.constant 0 : index
    %c0_42 = arith.constant 0 : index
    %c0_43 = arith.constant 0 : index
    %93 = vector.load %arg13[%c0_41, %c0_42, %c0_43] : memref<2x1x32xf32, #tpu.memory_space<vmem>>, vector<1x1x32xf32>
    %94 = vector.shape_cast %93 : vector<1x1x32xf32> to vector<1x32xf32>
    %cst_44 = arith.constant dense<0.000000e+00> : vector<16xf32>
    %95 = vector.multi_reduction <add>, %90, %cst_44 [1] : vector<16x32xf32> to vector<16xf32>
    %96 = vector.shape_cast %95 : vector<16xf32> to vector<16x1xf32>
    %cst_45 = arith.constant 3.200000e+01 : f32
    %97 = vector.broadcast %cst_45 : f32 to vector<16x1xf32>
    %98 = arith.divf %96, %97 : vector<16x1xf32>
    %99 = vector.broadcast %98 : vector<16x1xf32> to vector<16x32xf32>
    %100 = arith.subf %90, %99 : vector<16x32xf32>
    %101 = arith.mulf %100, %100 : vector<16x32xf32>
    %cst_46 = arith.constant dense<0.000000e+00> : vector<16xf32>
    %102 = vector.multi_reduction <add>, %101, %cst_46 [1] : vector<16x32xf32> to vector<16xf32>
    %103 = vector.shape_cast %102 : vector<16xf32> to vector<16x1xf32>
    %cst_47 = arith.constant 3.200000e+01 : f32
    %104 = vector.broadcast %cst_47 : f32 to vector<16x1xf32>
    %105 = arith.divf %103, %104 : vector<16x1xf32>
    %cst_48 = arith.constant 9.99999996E-13 : f32
    %106 = vector.broadcast %cst_48 : f32 to vector<16x1xf32>
    %107 = arith.addf %105, %106 : vector<16x1xf32>
    %108 = math.rsqrt %107 : vector<16x1xf32>
    %109 = vector.broadcast %108 : vector<16x1xf32> to vector<16x32xf32>
    %110 = arith.mulf %100, %109 : vector<16x32xf32>
    %111 = vector.broadcast %92 : vector<1x32xf32> to vector<16x32xf32>
    %112 = arith.mulf %110, %111 : vector<16x32xf32>
    %113 = vector.broadcast %94 : vector<1x32xf32> to vector<16x32xf32>
    %114 = arith.addf %112, %113 : vector<16x32xf32>
    %c0_49 = arith.constant 0 : index
    %c0_50 = arith.constant 0 : index
    %c0_51 = arith.constant 0 : index
    %115 = vector.load %arg14[%c0_49, %c0_50, %c0_51] : memref<2x32x64xf32, #tpu.memory_space<vmem>>, vector<1x32x64xf32>
    %116 = vector.shape_cast %115 : vector<1x32x64xf32> to vector<32x64xf32>
    %cst_52 = arith.constant dense<0.000000e+00> : vector<16x64xf32>
    %117 = tpu.matmul %114, %116, %cst_52 {dimension_numbers = #tpu.dot_dimension_numbers<[1], [0], [0], [1], [0, 0, 1, 1], [], []>} : vector<16x32xf32>, vector<32x64xf32>, vector<16x64xf32> -> vector<16x64xf32>
    %c0_53 = arith.constant 0 : index
    %c0_54 = arith.constant 0 : index
    %c0_55 = arith.constant 0 : index
    %118 = vector.load %arg15[%c0_53, %c0_54, %c0_55] : memref<2x1x64xf32, #tpu.memory_space<vmem>>, vector<1x1x64xf32>
    %119 = vector.shape_cast %118 : vector<1x1x64xf32> to vector<1x64xf32>
    %120 = vector.broadcast %119 : vector<1x64xf32> to vector<16x64xf32>
    %121 = arith.addf %117, %120 : vector<16x64xf32>
    %122 = arith.mulf %121, %121 : vector<16x64xf32>
    %123 = arith.mulf %121, %122 : vector<16x64xf32>
    %cst_56 = arith.constant 4.471500e-02 : f32
    %124 = vector.broadcast %cst_56 : f32 to vector<16x64xf32>
    %125 = arith.mulf %124, %123 : vector<16x64xf32>
    %126 = arith.addf %121, %125 : vector<16x64xf32>
    %cst_57 = arith.constant 0.797884583 : f32
    %127 = vector.broadcast %cst_57 : f32 to vector<16x64xf32>
    %128 = arith.mulf %127, %126 : vector<16x64xf32>
    %129 = math.tanh %128 : vector<16x64xf32>
    %cst_58 = arith.constant 1.000000e+00 : f32
    %130 = vector.broadcast %cst_58 : f32 to vector<16x64xf32>
    %131 = arith.addf %130, %129 : vector<16x64xf32>
    %cst_59 = arith.constant 5.000000e-01 : f32
    %132 = vector.broadcast %cst_59 : f32 to vector<16x64xf32>
    %133 = arith.mulf %132, %131 : vector<16x64xf32>
    %134 = arith.mulf %121, %133 : vector<16x64xf32>
    %c0_60 = arith.constant 0 : index
    %c0_61 = arith.constant 0 : index
    %c0_62 = arith.constant 0 : index
    %135 = vector.load %arg16[%c0_60, %c0_61, %c0_62] : memref<2x64x32xf32, #tpu.memory_space<vmem>>, vector<1x64x32xf32>
    %136 = vector.shape_cast %135 : vector<1x64x32xf32> to vector<64x32xf32>
    %cst_63 = arith.constant dense<0.000000e+00> : vector<16x32xf32>
    %137 = tpu.matmul %134, %136, %cst_63 {dimension_numbers = #tpu.dot_dimension_numbers<[1], [0], [0], [1], [0, 0, 1, 1], [], []>} : vector<16x64xf32>, vector<64x32xf32>, vector<16x32xf32> -> vector<16x32xf32>
    %c0_64 = arith.constant 0 : index
    %c0_65 = arith.constant 0 : index
    %c0_66 = arith.constant 0 : index
    %138 = vector.load %arg17[%c0_64, %c0_65, %c0_66] : memref<2x1x32xf32, #tpu.memory_space<vmem>>, vector<1x1x32xf32>
    %139 = vector.shape_cast %138 : vector<1x1x32xf32> to vector<1x32xf32>
    %140 = vector.broadcast %139 : vector<1x32xf32> to vector<16x32xf32>
    %141 = arith.addf %137, %140 : vector<16x32xf32>
    %142 = arith.addf %114, %141 : vector<16x32xf32>
    %c0_67 = arith.constant 0 : index
    %c0_68 = arith.constant 0 : index
    %c0_69 = arith.constant 0 : index
    %143 = vector.load %arg18[%c0_67, %c0_68, %c0_69] : memref<2x1x32xf32, #tpu.memory_space<vmem>>, vector<1x1x32xf32>
    %144 = vector.shape_cast %143 : vector<1x1x32xf32> to vector<1x32xf32>
    %c0_70 = arith.constant 0 : index
    %c0_71 = arith.constant 0 : index
    %c0_72 = arith.constant 0 : index
    %145 = vector.load %arg19[%c0_70, %c0_71, %c0_72] : memref<2x1x32xf32, #tpu.memory_space<vmem>>, vector<1x1x32xf32>
    %146 = vector.shape_cast %145 : vector<1x1x32xf32> to vector<1x32xf32>
    %cst_73 = arith.constant dense<0.000000e+00> : vector<16xf32>
    %147 = vector.multi_reduction <add>, %142, %cst_73 [1] : vector<16x32xf32> to vector<16xf32>
    %148 = vector.shape_cast %147 : vector<16xf32> to vector<16x1xf32>
    %cst_74 = arith.constant 3.200000e+01 : f32
    %149 = vector.broadcast %cst_74 : f32 to vector<16x1xf32>
    %150 = arith.divf %148, %149 : vector<16x1xf32>
    %151 = vector.broadcast %150 : vector<16x1xf32> to vector<16x32xf32>
    %152 = arith.subf %142, %151 : vector<16x32xf32>
    %153 = arith.mulf %152, %152 : vector<16x32xf32>
    %cst_75 = arith.constant dense<0.000000e+00> : vector<16xf32>
    %154 = vector.multi_reduction <add>, %153, %cst_75 [1] : vector<16x32xf32> to vector<16xf32>
    %155 = vector.shape_cast %154 : vector<16xf32> to vector<16x1xf32>
    %cst_76 = arith.constant 3.200000e+01 : f32
    %156 = vector.broadcast %cst_76 : f32 to vector<16x1xf32>
    %157 = arith.divf %155, %156 : vector<16x1xf32>
    %cst_77 = arith.constant 9.99999996E-13 : f32
    %158 = vector.broadcast %cst_77 : f32 to vector<16x1xf32>
    %159 = arith.addf %157, %158 : vector<16x1xf32>
    %160 = math.rsqrt %159 : vector<16x1xf32>
    %161 = vector.broadcast %160 : vector<16x1xf32> to vector<16x32xf32>
    %162 = arith.mulf %152, %161 : vector<16x32xf32>
    %163 = vector.broadcast %144 : vector<1x32xf32> to vector<16x32xf32>
    %164 = arith.mulf %162, %163 : vector<16x32xf32>
    %165 = vector.broadcast %146 : vector<1x32xf32> to vector<16x32xf32>
    %166 = arith.addf %164, %165 : vector<16x32xf32>
    %c1 = arith.constant 1 : index
    %c0_78 = arith.constant 0 : index
    %c0_79 = arith.constant 0 : index
    %167 = vector.load %arg8[%c1, %c0_78, %c0_79] : memref<2x32x96xf32, #tpu.memory_space<vmem>>, vector<1x32x96xf32>
    %168 = vector.shape_cast %167 : vector<1x32x96xf32> to vector<32x96xf32>
    %cst_80 = arith.constant dense<0.000000e+00> : vector<16x96xf32>
    %169 = tpu.matmul %166, %168, %cst_80 {dimension_numbers = #tpu.dot_dimension_numbers<[1], [0], [0], [1], [0, 0, 1, 1], [], []>} : vector<16x32xf32>, vector<32x96xf32>, vector<16x96xf32> -> vector<16x96xf32>
    %c1_81 = arith.constant 1 : index
    %c0_82 = arith.constant 0 : index
    %c0_83 = arith.constant 0 : index
    %170 = vector.load %arg9[%c1_81, %c0_82, %c0_83] : memref<2x1x96xf32, #tpu.memory_space<vmem>>, vector<1x1x96xf32>
    %171 = vector.shape_cast %170 : vector<1x1x96xf32> to vector<1x96xf32>
    %172 = vector.broadcast %171 : vector<1x96xf32> to vector<16x96xf32>
    %173 = arith.addf %169, %172 : vector<16x96xf32>
    %174 = vector.extract_strided_slice %173 {offsets = [0, 0], sizes = [16, 32], strides = [1, 1]} : vector<16x96xf32> to vector<16x32xf32>
    %175 = vector.shape_cast %174 : vector<16x32xf32> to vector<2x8x32xf32>
    %176 = vector.extract_strided_slice %173 {offsets = [0, 32], sizes = [16, 32], strides = [1, 1]} : vector<16x96xf32> to vector<16x32xf32>
    %177 = vector.shape_cast %176 : vector<16x32xf32> to vector<2x8x32xf32>
    %178 = vector.extract_strided_slice %173 {offsets = [0, 64], sizes = [16, 32], strides = [1, 1]} : vector<16x96xf32> to vector<16x32xf32>
    %179 = vector.shape_cast %178 : vector<16x32xf32> to vector<2x8x32xf32>
    %180 = vector.extract_strided_slice %175 {offsets = [0, 0, 0], sizes = [2, 8, 16], strides = [1, 1, 1]} : vector<2x8x32xf32> to vector<2x8x16xf32>
    %181 = vector.extract_strided_slice %175 {offsets = [0, 0, 16], sizes = [2, 8, 16], strides = [1, 1, 1]} : vector<2x8x32xf32> to vector<2x8x16xf32>
    %182 = tpu.concatenate %180, %181 in 0 : vector<2x8x16xf32>, vector<2x8x16xf32> -> vector<4x8x16xf32>
    %183 = vector.extract_strided_slice %177 {offsets = [0, 0, 0], sizes = [2, 8, 16], strides = [1, 1, 1]} : vector<2x8x32xf32> to vector<2x8x16xf32>
    %184 = vector.extract_strided_slice %177 {offsets = [0, 0, 16], sizes = [2, 8, 16], strides = [1, 1, 1]} : vector<2x8x32xf32> to vector<2x8x16xf32>
    %185 = tpu.concatenate %183, %184 in 0 : vector<2x8x16xf32>, vector<2x8x16xf32> -> vector<4x8x16xf32>
    %186 = vector.extract_strided_slice %179 {offsets = [0, 0, 0], sizes = [2, 8, 16], strides = [1, 1, 1]} : vector<2x8x32xf32> to vector<2x8x16xf32>
    %187 = vector.extract_strided_slice %179 {offsets = [0, 0, 16], sizes = [2, 8, 16], strides = [1, 1, 1]} : vector<2x8x32xf32> to vector<2x8x16xf32>
    %188 = tpu.concatenate %186, %187 in 0 : vector<2x8x16xf32>, vector<2x8x16xf32> -> vector<4x8x16xf32>
    "tpu.trace_start"() <{level = 10 : i32, message = "nqd,nkd->nqk"}> : () -> ()
    %cst_84 = arith.constant dense<0.000000e+00> : vector<4x8x8xf32>
    %189 = tpu.matmul %182, %185, %cst_84 {dimension_numbers = #tpu.dot_dimension_numbers<[2], [2], [1], [1], [0, 0, 0, 1, 1, 1], [0], [0]>} : vector<4x8x16xf32>, vector<4x8x16xf32>, vector<4x8x8xf32> -> vector<4x8x8xf32>
    "tpu.trace_stop"() : () -> ()
    %190 = vector.shape_cast %41 : vector<4x8xf32> to vector<4x1x8xf32>
    %191 = vector.broadcast %190 : vector<4x1x8xf32> to vector<4x8x8xf32>
    %192 = arith.addf %189, %191 : vector<4x8x8xf32>
    %cst_85 = arith.constant dense<0xFF800000> : vector<4x8xf32>
    %193 = vector.multi_reduction <maximumf>, %192, %cst_85 [2] : vector<4x8x8xf32> to vector<4x8xf32>
    %194 = vector.shape_cast %193 : vector<4x8xf32> to vector<4x8x1xf32>
    %195 = vector.broadcast %194 : vector<4x8x1xf32> to vector<4x8x8xf32>
    %196 = arith.subf %192, %195 : vector<4x8x8xf32>
    %197 = math.exp %196 : vector<4x8x8xf32>
    %cst_86 = arith.constant dense<0.000000e+00> : vector<4x8xf32>
    %198 = vector.multi_reduction <add>, %197, %cst_86 [2] : vector<4x8x8xf32> to vector<4x8xf32>
    %199 = vector.shape_cast %198 : vector<4x8xf32> to vector<4x8x1xf32>
    %200 = vector.broadcast %199 : vector<4x8x1xf32> to vector<4x8x8xf32>
    %201 = arith.divf %197, %200 : vector<4x8x8xf32>
    "tpu.trace_start"() <{level = 10 : i32, message = "nqk,nkd->nqd"}> : () -> ()
    %cst_87 = arith.constant dense<0.000000e+00> : vector<4x8x16xf32>
    %202 = tpu.matmul %201, %188, %cst_87 {dimension_numbers = #tpu.dot_dimension_numbers<[2], [1], [1], [2], [0, 0, 0, 1, 1, 2], [0], [0]>} : vector<4x8x8xf32>, vector<4x8x16xf32>, vector<4x8x16xf32> -> vector<4x8x16xf32>
    "tpu.trace_stop"() : () -> ()
    %203 = vector.extract_strided_slice %202 {offsets = [0, 0, 0], sizes = [2, 8, 16], strides = [1, 1, 1]} : vector<4x8x16xf32> to vector<2x8x16xf32>
    %204 = vector.shape_cast %203 : vector<2x8x16xf32> to vector<16x16xf32>
    %205 = vector.extract_strided_slice %202 {offsets = [2, 0, 0], sizes = [2, 8, 16], strides = [1, 1, 1]} : vector<4x8x16xf32> to vector<2x8x16xf32>
    %206 = vector.shape_cast %205 : vector<2x8x16xf32> to vector<16x16xf32>
    %207 = tpu.concatenate %204, %206 in 1 : vector<16x16xf32>, vector<16x16xf32> -> vector<16x32xf32>
    %c1_88 = arith.constant 1 : index
    %c0_89 = arith.constant 0 : index
    %c0_90 = arith.constant 0 : index
    %208 = vector.load %arg10[%c1_88, %c0_89, %c0_90] : memref<2x32x32xf32, #tpu.memory_space<vmem>>, vector<1x32x32xf32>
    %209 = vector.shape_cast %208 : vector<1x32x32xf32> to vector<32x32xf32>
    %cst_91 = arith.constant dense<0.000000e+00> : vector<16x32xf32>
    %210 = tpu.matmul %207, %209, %cst_91 {dimension_numbers = #tpu.dot_dimension_numbers<[1], [0], [0], [1], [0, 0, 1, 1], [], []>} : vector<16x32xf32>, vector<32x32xf32>, vector<16x32xf32> -> vector<16x32xf32>
    %c1_92 = arith.constant 1 : index
    %c0_93 = arith.constant 0 : index
    %c0_94 = arith.constant 0 : index
    %211 = vector.load %arg11[%c1_92, %c0_93, %c0_94] : memref<2x1x32xf32, #tpu.memory_space<vmem>>, vector<1x1x32xf32>
    %212 = vector.shape_cast %211 : vector<1x1x32xf32> to vector<1x32xf32>
    %213 = vector.broadcast %212 : vector<1x32xf32> to vector<16x32xf32>
    %214 = arith.addf %210, %213 : vector<16x32xf32>
    %215 = arith.addf %166, %214 : vector<16x32xf32>
    %c1_95 = arith.constant 1 : index
    %c0_96 = arith.constant 0 : index
    %c0_97 = arith.constant 0 : index
    %216 = vector.load %arg12[%c1_95, %c0_96, %c0_97] : memref<2x1x32xf32, #tpu.memory_space<vmem>>, vector<1x1x32xf32>
    %217 = vector.shape_cast %216 : vector<1x1x32xf32> to vector<1x32xf32>
    %c1_98 = arith.constant 1 : index
    %c0_99 = arith.constant 0 : index
    %c0_100 = arith.constant 0 : index
    %218 = vector.load %arg13[%c1_98, %c0_99, %c0_100] : memref<2x1x32xf32, #tpu.memory_space<vmem>>, vector<1x1x32xf32>
    %219 = vector.shape_cast %218 : vector<1x1x32xf32> to vector<1x32xf32>
    %cst_101 = arith.constant dense<0.000000e+00> : vector<16xf32>
    %220 = vector.multi_reduction <add>, %215, %cst_101 [1] : vector<16x32xf32> to vector<16xf32>
    %221 = vector.shape_cast %220 : vector<16xf32> to vector<16x1xf32>
    %cst_102 = arith.constant 3.200000e+01 : f32
    %222 = vector.broadcast %cst_102 : f32 to vector<16x1xf32>
    %223 = arith.divf %221, %222 : vector<16x1xf32>
    %224 = vector.broadcast %223 : vector<16x1xf32> to vector<16x32xf32>
    %225 = arith.subf %215, %224 : vector<16x32xf32>
    %226 = arith.mulf %225, %225 : vector<16x32xf32>
    %cst_103 = arith.constant dense<0.000000e+00> : vector<16xf32>
    %227 = vector.multi_reduction <add>, %226, %cst_103 [1] : vector<16x32xf32> to vector<16xf32>
    %228 = vector.shape_cast %227 : vector<16xf32> to vector<16x1xf32>
    %cst_104 = arith.constant 3.200000e+01 : f32
    %229 = vector.broadcast %cst_104 : f32 to vector<16x1xf32>
    %230 = arith.divf %228, %229 : vector<16x1xf32>
    %cst_105 = arith.constant 9.99999996E-13 : f32
    %231 = vector.broadcast %cst_105 : f32 to vector<16x1xf32>
    %232 = arith.addf %230, %231 : vector<16x1xf32>
    %233 = math.rsqrt %232 : vector<16x1xf32>
    %234 = vector.broadcast %233 : vector<16x1xf32> to vector<16x32xf32>
    %235 = arith.mulf %225, %234 : vector<16x32xf32>
    %236 = vector.broadcast %217 : vector<1x32xf32> to vector<16x32xf32>
    %237 = arith.mulf %235, %236 : vector<16x32xf32>
    %238 = vector.broadcast %219 : vector<1x32xf32> to vector<16x32xf32>
    %239 = arith.addf %237, %238 : vector<16x32xf32>
    %c1_106 = arith.constant 1 : index
    %c0_107 = arith.constant 0 : index
    %c0_108 = arith.constant 0 : index
    %240 = vector.load %arg14[%c1_106, %c0_107, %c0_108] : memref<2x32x64xf32, #tpu.memory_space<vmem>>, vector<1x32x64xf32>
    %241 = vector.shape_cast %240 : vector<1x32x64xf32> to vector<32x64xf32>
    %cst_109 = arith.constant dense<0.000000e+00> : vector<16x64xf32>
    %242 = tpu.matmul %239, %241, %cst_109 {dimension_numbers = #tpu.dot_dimension_numbers<[1], [0], [0], [1], [0, 0, 1, 1], [], []>} : vector<16x32xf32>, vector<32x64xf32>, vector<16x64xf32> -> vector<16x64xf32>
    %c1_110 = arith.constant 1 : index
    %c0_111 = arith.constant 0 : index
    %c0_112 = arith.constant 0 : index
    %243 = vector.load %arg15[%c1_110, %c0_111, %c0_112] : memref<2x1x64xf32, #tpu.memory_space<vmem>>, vector<1x1x64xf32>
    %244 = vector.shape_cast %243 : vector<1x1x64xf32> to vector<1x64xf32>
    %245 = vector.broadcast %244 : vector<1x64xf32> to vector<16x64xf32>
    %246 = arith.addf %242, %245 : vector<16x64xf32>
    %247 = arith.mulf %246, %246 : vector<16x64xf32>
    %248 = arith.mulf %246, %247 : vector<16x64xf32>
    %cst_113 = arith.constant 4.471500e-02 : f32
    %249 = vector.broadcast %cst_113 : f32 to vector<16x64xf32>
    %250 = arith.mulf %249, %248 : vector<16x64xf32>
    %251 = arith.addf %246, %250 : vector<16x64xf32>
    %cst_114 = arith.constant 0.797884583 : f32
    %252 = vector.broadcast %cst_114 : f32 to vector<16x64xf32>
    %253 = arith.mulf %252, %251 : vector<16x64xf32>
    %254 = math.tanh %253 : vector<16x64xf32>
    %cst_115 = arith.constant 1.000000e+00 : f32
    %255 = vector.broadcast %cst_115 : f32 to vector<16x64xf32>
    %256 = arith.addf %255, %254 : vector<16x64xf32>
    %cst_116 = arith.constant 5.000000e-01 : f32
    %257 = vector.broadcast %cst_116 : f32 to vector<16x64xf32>
    %258 = arith.mulf %257, %256 : vector<16x64xf32>
    %259 = arith.mulf %246, %258 : vector<16x64xf32>
    %c1_117 = arith.constant 1 : index
    %c0_118 = arith.constant 0 : index
    %c0_119 = arith.constant 0 : index
    %260 = vector.load %arg16[%c1_117, %c0_118, %c0_119] : memref<2x64x32xf32, #tpu.memory_space<vmem>>, vector<1x64x32xf32>
    %261 = vector.shape_cast %260 : vector<1x64x32xf32> to vector<64x32xf32>
    %cst_120 = arith.constant dense<0.000000e+00> : vector<16x32xf32>
    %262 = tpu.matmul %259, %261, %cst_120 {dimension_numbers = #tpu.dot_dimension_numbers<[1], [0], [0], [1], [0, 0, 1, 1], [], []>} : vector<16x64xf32>, vector<64x32xf32>, vector<16x32xf32> -> vector<16x32xf32>
    %c1_121 = arith.constant 1 : index
    %c0_122 = arith.constant 0 : index
    %c0_123 = arith.constant 0 : index
    %263 = vector.load %arg17[%c1_121, %c0_122, %c0_123] : memref<2x1x32xf32, #tpu.memory_space<vmem>>, vector<1x1x32xf32>
    %264 = vector.shape_cast %263 : vector<1x1x32xf32> to vector<1x32xf32>
    %265 = vector.broadcast %264 : vector<1x32xf32> to vector<16x32xf32>
    %266 = arith.addf %262, %265 : vector<16x32xf32>
    %267 = arith.addf %239, %266 : vector<16x32xf32>
    %c1_124 = arith.constant 1 : index
    %c0_125 = arith.constant 0 : index
    %c0_126 = arith.constant 0 : index
    %268 = vector.load %arg18[%c1_124, %c0_125, %c0_126] : memref<2x1x32xf32, #tpu.memory_space<vmem>>, vector<1x1x32xf32>
    %269 = vector.shape_cast %268 : vector<1x1x32xf32> to vector<1x32xf32>
    %c1_127 = arith.constant 1 : index
    %c0_128 = arith.constant 0 : index
    %c0_129 = arith.constant 0 : index
    %270 = vector.load %arg19[%c1_127, %c0_128, %c0_129] : memref<2x1x32xf32, #tpu.memory_space<vmem>>, vector<1x1x32xf32>
    %271 = vector.shape_cast %270 : vector<1x1x32xf32> to vector<1x32xf32>
    %cst_130 = arith.constant dense<0.000000e+00> : vector<16xf32>
    %272 = vector.multi_reduction <add>, %267, %cst_130 [1] : vector<16x32xf32> to vector<16xf32>
    %273 = vector.shape_cast %272 : vector<16xf32> to vector<16x1xf32>
    %cst_131 = arith.constant 3.200000e+01 : f32
    %274 = vector.broadcast %cst_131 : f32 to vector<16x1xf32>
    %275 = arith.divf %273, %274 : vector<16x1xf32>
    %276 = vector.broadcast %275 : vector<16x1xf32> to vector<16x32xf32>
    %277 = arith.subf %267, %276 : vector<16x32xf32>
    %278 = arith.mulf %277, %277 : vector<16x32xf32>
    %cst_132 = arith.constant dense<0.000000e+00> : vector<16xf32>
    %279 = vector.multi_reduction <add>, %278, %cst_132 [1] : vector<16x32xf32> to vector<16xf32>
    %280 = vector.shape_cast %279 : vector<16xf32> to vector<16x1xf32>
    %cst_133 = arith.constant 3.200000e+01 : f32
    %281 = vector.broadcast %cst_133 : f32 to vector<16x1xf32>
    %282 = arith.divf %280, %281 : vector<16x1xf32>
    %cst_134 = arith.constant 9.99999996E-13 : f32
    %283 = vector.broadcast %cst_134 : f32 to vector<16x1xf32>
    %284 = arith.addf %282, %283 : vector<16x1xf32>
    %285 = math.rsqrt %284 : vector<16x1xf32>
    %286 = vector.broadcast %285 : vector<16x1xf32> to vector<16x32xf32>
    %287 = arith.mulf %277, %286 : vector<16x32xf32>
    %288 = vector.broadcast %269 : vector<1x32xf32> to vector<16x32xf32>
    %289 = arith.mulf %287, %288 : vector<16x32xf32>
    %290 = vector.broadcast %271 : vector<1x32xf32> to vector<16x32xf32>
    %291 = arith.addf %289, %290 : vector<16x32xf32>
    %c0_135 = arith.constant 0 : index
    %c0_136 = arith.constant 0 : index
    %292 = vector.load %arg22[%c0_135, %c0_136] : memref<16x32xf32, #tpu.memory_space<vmem>>, vector<16x32xf32>
    tpu.vector_store %arg22[%c0_135, %c0_136], %291 {strides = array<i32>} : memref<16x32xf32, #tpu.memory_space<vmem>>, vector<16x32xf32>,
    %293 = vector.extract_strided_slice %291 {offsets = [0, 0], sizes = [1, 32], strides = [1, 1]} : vector<16x32xf32> to vector<1x32xf32>
    %294 = vector.extract_strided_slice %291 {offsets = [8, 0], sizes = [1, 32], strides = [1, 1]} : vector<16x32xf32> to vector<1x32xf32>
    %295 = tpu.concatenate %293, %294 in 0 : vector<1x32xf32>, vector<1x32xf32> -> vector<2x32xf32>
    %c0_137 = arith.constant 0 : index
    %c0_138 = arith.constant 0 : index
    %296 = vector.load %arg20[%c0_137, %c0_138] : memref<32x32xf32, #tpu.memory_space<vmem>>, vector<32x32xf32>
    %cst_139 = arith.constant dense<0.000000e+00> : vector<2x32xf32>
    %297 = tpu.matmul %295, %296, %cst_139 {dimension_numbers = #tpu.dot_dimension_numbers<[1], [0], [0], [1], [0, 0, 1, 1], [], []>} : vector<2x32xf32>, vector<32x32xf32>, vector<2x32xf32> -> vector<2x32xf32>
    %c0_140 = arith.constant 0 : index
    %c0_141 = arith.constant 0 : index
    %298 = vector.load %arg21[%c0_140, %c0_141] : memref<1x32xf32, #tpu.memory_space<vmem>>, vector<1x32xf32>
    %299 = vector.broadcast %298 : vector<1x32xf32> to vector<2x32xf32>
    %300 = arith.addf %297, %299 : vector<2x32xf32>
    %301 = math.tanh %300 : vector<2x32xf32>
    %c0_142 = arith.constant 0 : index
    %c0_143 = arith.constant 0 : index
    %302 = vector.load %arg23[%c0_142, %c0_143] : memref<2x32xf32, #tpu.memory_space<vmem>>, vector<2x32xf32>
    tpu.vector_store %arg23[%c0_142, %c0_143], %301 {strides = array<i32>} : memref<2x32xf32, #tpu.memory_space<vmem>>, vector<2x32xf32>,
    return
  }
  func.func @transform_0(%arg0: i32) -> (i32, i32) {
    %c0_i32 = arith.constant 0 : i32
    %c0_i32_0 = arith.constant 0 : i32
    %c0_i32_1 = arith.constant 0 : i32
    return %c0_i32, %c0_i32_0 : i32, i32
  }
  func.func @transform_1(%arg0: i32) -> (i32, i32) {
    %c0_i32 = arith.constant 0 : i32
    %c0_i32_0 = arith.constant 0 : i32
    %c0_i32_1 = arith.constant 0 : i32
    return %c0_i32, %c0_i32_0 : i32, i32
  }
  func.func @transform_2(%arg0: i32) -> (i32, i32) {
    %c0_i32 = arith.constant 0 : i32
    %c0_i32_0 = arith.constant 0 : i32
    %c0_i32_1 = arith.constant 0 : i32
    return %c0_i32, %c0_i32_0 : i32, i32
  }
  func.func @transform_3(%arg0: i32) -> (i32, i32) {
    %c0_i32 = arith.constant 0 : i32
    %c0_i32_0 = arith.constant 0 : i32
    %c0_i32_1 = arith.constant 0 : i32
    return %c0_i32, %c0_i32_0 : i32, i32
  }
  func.func @transform_4(%arg0: i32) -> (i32, i32) {
    %c0_i32 = arith.constant 0 : i32
    %c0_i32_0 = arith.constant 0 : i32
    %c0_i32_1 = arith.constant 0 : i32
    return %c0_i32, %c0_i32_0 : i32, i32
  }
  func.func @transform_5(%arg0: i32) -> (i32, i32) {
    %c0_i32 = arith.constant 0 : i32
    %c0_i32_0 = arith.constant 0 : i32
    %c0_i32_1 = arith.constant 0 : i32
    return %c0_i32, %c0_i32_0 : i32, i32
  }
  func.func @transform_6(%arg0: i32) -> (i32, i32) {
    %c0_i32 = arith.constant 0 : i32
    %c0_i32_0 = arith.constant 0 : i32
    %c0_i32_1 = arith.constant 0 : i32
    return %c0_i32, %c0_i32_0 : i32, i32
  }
  func.func @transform_7(%arg0: i32) -> (i32, i32, i32) {
    %c0_i32 = arith.constant 0 : i32
    %c0_i32_0 = arith.constant 0 : i32
    %c0_i32_1 = arith.constant 0 : i32
    %c0_i32_2 = arith.constant 0 : i32
    return %c0_i32, %c0_i32_0, %c0_i32_1 : i32, i32, i32
  }
  func.func @transform_8(%arg0: i32) -> (i32, i32, i32) {
    %c0_i32 = arith.constant 0 : i32
    %c0_i32_0 = arith.constant 0 : i32
    %c0_i32_1 = arith.constant 0 : i32
    %c0_i32_2 = arith.constant 0 : i32
    return %c0_i32, %c0_i32_0, %c0_i32_1 : i32, i32, i32
  }
  func.func @transform_9(%arg0: i32) -> (i32, i32, i32) {
    %c0_i32 = arith.constant 0 : i32
    %c0_i32_0 = arith.constant 0 : i32
    %c0_i32_1 = arith.constant 0 : i32
    %c0_i32_2 = arith.constant 0 : i32
    return %c0_i32, %c0_i32_0, %c0_i32_1 : i32, i32, i32
  }
  func.func @transform_10(%arg0: i32) -> (i32, i32, i32) {
    %c0_i32 = arith.constant 0 : i32
    %c0_i32_0 = arith.constant 0 : i32
    %c0_i32_1 = arith.constant 0 : i32
    %c0_i32_2 = arith.constant 0 : i32
    return %c0_i32, %c0_i32_0, %c0_i32_1 : i32, i32, i32
  }
  func.func @transform_11(%arg0: i32) -> (i32, i32, i32) {
    %c0_i32 = arith.constant 0 : i32
    %c0_i32_0 = arith.constant 0 : i32
    %c0_i32_1 = arith.constant 0 : i32
    %c0_i32_2 = arith.constant 0 : i32
    return %c0_i32, %c0_i32_0, %c0_i32_1 : i32, i32, i32
  }
  func.func @transform_12(%arg0: i32) -> (i32, i32, i32) {
    %c0_i32 = arith.constant 0 : i32
    %c0_i32_0 = arith.constant 0 : i32
    %c0_i32_1 = arith.constant 0 : i32
    %c0_i32_2 = arith.constant 0 : i32
    return %c0_i32, %c0_i32_0, %c0_i32_1 : i32, i32, i32
  }
  func.func @transform_13(%arg0: i32) -> (i32, i32, i32) {
    %c0_i32 = arith.constant 0 : i32
    %c0_i32_0 = arith.constant 0 : i32
    %c0_i32_1 = arith.constant 0 : i32
    %c0_i32_2 = arith.constant 0 : i32
    return %c0_i32, %c0_i32_0, %c0_i32_1 : i32, i32, i32
  }
  func.func @transform_14(%arg0: i32) -> (i32, i32, i32) {
    %c0_i32 = arith.constant 0 : i32
    %c0_i32_0 = arith.constant 0 : i32
    %c0_i32_1 = arith.constant 0 : i32
    %c0_i32_2 = arith.constant 0 : i32
    return %c0_i32, %c0_i32_0, %c0_i32_1 : i32, i32, i32
  }
  func.func @transform_15(%arg0: i32) -> (i32, i32, i32) {
    %c0_i32 = arith.constant 0 : i32
    %c0_i32_0 = arith.constant 0 : i32
    %c0_i32_1 = arith.constant 0 : i32
    %c0_i32_2 = arith.constant 0 : i32
    return %c0_i32, %c0_i32_0, %c0_i32_1 : i32, i32, i32
  }
  func.func @transform_16(%arg0: i32) -> (i32, i32, i32) {
    %c0_i32 = arith.constant 0 : i32
    %c0_i32_0 = arith.constant 0 : i32
    %c0_i32_1 = arith.constant 0 : i32
    %c0_i32_2 = arith.constant 0 : i32
    return %c0_i32, %c0_i32_0, %c0_i32_1 : i32, i32, i32
  }
  func.func @transform_17(%arg0: i32) -> (i32, i32, i32) {
    %c0_i32 = arith.constant 0 : i32
    %c0_i32_0 = arith.constant 0 : i32
    %c0_i32_1 = arith.constant 0 : i32
    %c0_i32_2 = arith.constant 0 : i32
    return %c0_i32, %c0_i32_0, %c0_i32_1 : i32, i32, i32
  }
  func.func @transform_18(%arg0: i32) -> (i32, i32, i32) {
    %c0_i32 = arith.constant 0 : i32
    %c0_i32_0 = arith.constant 0 : i32
    %c0_i32_1 = arith.constant 0 : i32
    %c0_i32_2 = arith.constant 0 : i32
    return %c0_i32, %c0_i32_0, %c0_i32_1 : i32, i32, i32
  }
  func.func @transform_19(%arg0: i32) -> (i32, i32) {
    %c0_i32 = arith.constant 0 : i32
    %c0_i32_0 = arith.constant 0 : i32
    %c0_i32_1 = arith.constant 0 : i32
    return %c0_i32, %c0_i32_0 : i32, i32
  }
  func.func @transform_20(%arg0: i32) -> (i32, i32) {
    %c0_i32 = arith.constant 0 : i32
    %c0_i32_0 = arith.constant 0 : i32
    %c0_i32_1 = arith.constant 0 : i32
    return %c0_i32, %c0_i32_0 : i32, i32
  }
  func.func @transform_21(%arg0: i32) -> (i32, i32) {
    %c0_i32 = arith.constant 0 : i32
    %c0_i32_0 = arith.constant 0 : i32
    %c0_i32_1 = arith.constant 0 : i32
    return %c0_i32, %c0_i32_0 : i32, i32
  }
  func.func @transform_22(%arg0: i32) -> (i32, i32) {
    %c0_i32 = arith.constant 0 : i32
    %c0_i32_0 = arith.constant 0 : i32
    %c0_i32_1 = arith.constant 0 : i32
    return %c0_i32, %c0_i32_0 : i32, i32
  }
}

</mosaic_0001>

<bundles_post_ra>
// kernel: text_bert_encoding_forward.1
= control target key start
LH: loop header
LB: loop body
LE: loop exit
PB: predicated region body
PF: predicated region fallthrough
CT: control target
= control target key end

     0   :  { %s4016_s0 = inlined_call_operand.vmem [shape: s32[16,1], index: 0, kind: input, shape index: {}]   ;;  %s4017_s1 = inlined_call_operand.vmem [shape: f32[2,8], index: 1, kind: input, shape index: {}]   ;;  %s4018_s2 = inlined_call_operand.vmem [shape: f32[100,32], index: 2, kind: input, shape index: {}]   ;;  %s4019_s3 = inlined_call_operand.vmem [shape: f32[8,32], index: 3, kind: input, shape index: {}]   ;;  %s4020_s4 = inlined_call_operand.vmem [shape: f32[1,32], index: 4, kind: input, shape index: {}]   ;;  %s4021_s5 = inlined_call_operand.vmem [shape: f32[1,32], index: 5, kind: input, shape index: {}]   ;;  %s4022_s6 = inlined_call_operand.vmem [shape: f32[1,32], index: 6, kind: input, shape index: {}]   ;;  %s4023_s7 = inlined_call_operand.vmem [shape: f32[2,32,96], index: 7, kind: input, shape index: {}]   ;;  %s4024_s8 = inlined_call_operand.vmem [shape: f32[2,1,96], index: 8, kind: input, shape index: {}]   ;;  %s4025_s9 = inlined_call_operand.vmem [shape: f32[2,32,32], index: 9, kind: input, shape index: {}]   ;;  %s4026_s10 = inlined_call_operand.vmem [shape: f32[2,1,32], index: 10, kind: input, shape index: {}]   ;;  %s4027_s11 = inlined_call_operand.vmem [shape: f32[2,1,32], index: 11, kind: input, shape index: {}]   ;;  %s4028_s12 = inlined_call_operand.vmem [shape: f32[2,1,32], index: 12, kind: input, shape index: {}]   ;;  %s4029_s13 = inlined_call_operand.vmem [shape: f32[2,32,64], index: 13, kind: input, shape index: {}]   ;;  %s4030_s14 = inlined_call_operand.vmem [shape: f32[2,1,64], index: 14, kind: input, shape index: {}]   ;;  %s4031_s15 = inlined_call_operand.vmem [shape: f32[2,64,32], index: 15, kind: input, shape index: {}]   ;;  %s4032_s16 = inlined_call_operand.vmem [shape: f32[2,1,32], index: 16, kind: input, shape index: {}]   ;;  %s4033_s17 = inlined_call_operand.vmem [shape: f32[2,1,32], index: 17, kind: input, shape index: {}]   ;;  %s4034_s18 = inlined_call_operand.vmem [shape: f32[2,1,32], index: 18, kind: input, shape index: {}]   ;;  %s4035_s19 = inlined_call_operand.vmem [shape: f32[32,32], index: 19, kind: input, shape index: {}]   ;;  %s4036_s20 = inlined_call_operand.vmem [shape: f32[1,32], index: 20, kind: input, shape index: {}]   ;;  %s4037_s21 = inlined_call_operand.hbm [shape: f32[16,32], index: 21, kind: output, shape index: {0}]   ;;  %s4038_s22 = inlined_call_operand.hbm [shape: f32[2,32], index: 22, kind: output, shape index: {1}]  }
   0x1   :  { %4041 = sst [smem:[#allocation8_spill]] %s4016_s0 }
   0x2   :  { %4042 = sst [smem:[#allocation9_spill]] %s4017_s1 }
   0x3   :  { %4043 = sst [smem:[#allocation10_spill]] %s4018_s2 }
   0x4   :  { %4044 = sst [smem:[#allocation11_spill]] %s4019_s3 }
   0x5   :  { %4045 = sst [smem:[#allocation12_spill]] %s4020_s4 }
   0x6   :  { %4046 = sst [smem:[#allocation13_spill]] %s4021_s5 }
   0x7   :  { %4047 = sst [smem:[#allocation14_spill]] %s4022_s6 }
   0x8   :  { %28 = vsyncpa [#allocation3], 0  ;;  %s4048_s29 = sld [smem:[#allocation8_spill]]  ;;  %s4049_s0 = sld [smem:[#allocation10_spill]]  ;;  %v3395_v2 = vmov 0  }
   0x9   :  { %3284 = vset.pattern.permute.xlu0 %v3395_v2 }
   0xe   :  { %v72_v0 = vld [vmem:[%s4048_s29] sm:$0xff]  ;;  %v89_v3 = vld [vmem:[%s4049_s0 + $0x8] sm:$0xff]  ;;  %v90_v4 = vld [vmem:[%s4049_s0 + $0x10] sm:$0xff] }
   0xf   :  { %v88_v1 = vld [vmem:[%s4049_s0] sm:$0xff]  ;;  %v91_v5 = vld [vmem:[%s4049_s0 + $0x18] sm:$0xff]  ;;  %77 = vperm.xlu0 %3284, %v72_v0   ;;  %v73_v8 = vld [vmem:[%s4048_s29 + $0x8] sm:$0xff] }
  0x10   :  { %v3161_v6 = vpack.c.bf16 %v89_v3, %v88_v1  ;;  %v3165_v7 = vpack.c.bf16 %v91_v5, %v90_v4  ;;  %v92_v9 = vld [vmem:[%s4049_s0 + $0x20] sm:$0xff]  ;;  %v93_v10 = vld [vmem:[%s4049_s0 + $0x28] sm:$0xff] }
  0x12   :  { %3162 = vmatprep.subr.bf16.mxu0 %v3161_v6 }
  0x13   :  { %29 = vsyncpa [#allocation5], 0  ;;  %3164 = vmatpush3.bf16.msra.mxu0 %v3161_v6  ;;  %80 = vperm.xlu0 %3284, %v73_v8   ;;  %v3169_v11 = vpack.c.bf16 %v93_v10, %v92_v9  ;;  %v94_v12 = vld [vmem:[%s4049_s0 + $0x30] sm:$0xff]  ;;  %v95_v13 = vld [vmem:[%s4049_s0 + $0x38] sm:$0xff]  ;;  %vm109_vm0 = vcmask 1043456   ;;  %v3396_v22 = vmov 0.0   ;;  %v74_v23 = vlaneseq }
  0x14   :  { %3166 = vmatprep.subr.bf16.mxu0 %v3165_v7  ;;  %v3173_v14 = vpack.c.bf16 %v95_v13, %v94_v12  ;;  %v96_v15 = vld [vmem:[%s4049_s0 + $0x40] sm:$0xff]  ;;  %v97_v16 = vld [vmem:[%s4049_s0 + $0x48] sm:$0xff]  ;;  %v98_v18 = vld [vmem:[%s4049_s0 + $0x50] sm:$0xff]  ;;  %vm102_vm1 = vcmask 818176   ;;  %s4050_s23 = sld [smem:[#allocation11_spill]]  ;;  %s4051_s5 = sld [smem:[#allocation12_spill]] }
  0x15   :  { %v3177_v17 = vpack.c.bf16 %v97_v16, %v96_v15  ;;  %v99_v19 = vld [vmem:[%s4049_s0 + $0x58] sm:$0xff]  ;;  %v100_v21 = vld [vmem:[%s4049_s0 + $0x60] sm:$0xf]  ;;  %v75_v24 = vand.u32 127, %v74_v23  ;;  %vm199_vm4 = vcmask 261120   ;;  %v252_v50 = vld [vmem:[%s4023_s7 + $0x8] sm:$0xff] }
  0x16   :  { %v3181_v20 = vpack.c.bf16 %v99_v19, %v98_v18  ;;  %v251_v49 = vld [vmem:[%s4023_s7] sm:$0xff]  ;;  %v253_v51 = vld [vmem:[%s4023_s7 + $0x10] sm:$0xff]  ;;  %v254_v53 = vld [vmem:[%s4023_s7 + $0x18] sm:$0xff]  ;;  %s4052_s4 = sld [smem:[#allocation13_spill]]  ;;  %s4053_s29 = sld [smem:[#allocation14_spill]]  ;;  %vm3397_vm5 = vmmov 0  }
  0x17   :  { %3168 = vmatpush3.bf16.msra.mxu0 %v3165_v7  ;;  %v3185_v52 = vpack.c.bf16 %v252_v50, %v251_v49  ;;  %v3189_v54 = vpack.c.bf16 %v254_v53, %v253_v51  ;;  %v2743_v7 = vld [vmem:[%s4024_s8] ss:$0 sm:$0xff]  ;;  %s3398_s6 = smov 112   ;;  %s3399_s25 = smov 96   ;;  %vm396_vm6 = vcmask 130048   ;;  %vm249_vm7 = vcmask 1041408  }
  0x18   :  { %3170 = vmatprep.subr.bf16.mxu0 %v3169_v11  ;;  %s4054_s27 = sld [smem:[#allocation9_spill]]  ;;  %vm699_vm8 = vcmask 64512   ;;  %s3401_s3 = smov 64   ;;  %vm1321_vm9 = vcmask 523264   ;;  %vm2616_vm10 = vcmask 1040384  }
  0x19   :  { %3186 = vmatprep.subr.bf16.mxu1 %v3185_v52  ;;  %s3402_s24 = smov 16  }
  0x1a   :  { %v101_v29 = vld [vmem:[%s4050_s23] sm:$0xff]  ;;  %3188 = vmatpush3.bf16.msra.mxu1 %v3185_v52 }
  0x1b   :  { %3172 = vmatpush3.bf16.msra.mxu0 %v3169_v11  ;;  %v2740_v32 = vld [vmem:[%s4051_s5] ss:$0 sm:$0xff]  ;;  %3190 = vmatprep.subr.bf16.mxu1 %v3189_v54 }
  0x1c   :  { %3174 = vmatprep.subr.bf16.mxu0 %v3173_v14  ;;  %v2741_v62 = vld [vmem:[%s4052_s4] ss:$0 sm:$0xff] }
  0x1d   :  { %v2742_v0 = vld [vmem:[%s4053_s29] ss:$0 sm:$0xff] }
  0x1e   :  { %3192 = vmatpush3.bf16.msra.mxu1 %v3189_v54  ;;  %v243_v18 = vld [vmem:[%s4054_s27] sm:$0x3] }
  0x1f   :  { %3176 = vmatpush3.bf16.msra.mxu0 %v3173_v14  ;;  %2982 = vmatprep.subr.mxu1 %v3396_v22  ;;  %v244_v19 = vsub.f32 1.0, %v243_v18 }
  0x20   :  { %3178 = vmatprep.subr.bf16.mxu0 %v3177_v17 }
  0x23   :  { %3180 = vmatpush3.bf16.msra.mxu0 %v3177_v17 }
  0x24   :  { %3182 = vmatprep.subr.bf16.mxu0 %v3181_v20 }
  0x27   :  { %3184 = vmatpush3.bf16.msra.mxu0 %v3181_v20  ;;  %v3400_v20 = vmov 1966171168  }
  0x28   :  { %2961 = vmatprep.subr.msk.mxu0 %vm109_vm0, %v100_v21 }
  0x2b   :  { %2962 = vmatpush3.msk.msra.mxu0 %vm109_vm0, %v100_v21  ;;  %v351_v21 = vunpack.c.l.s4 %v3400_v20 }
  0x2c   :  { %2977 = vmatprep.subr.mxu0 %v3396_v22 }
  0x8e   :  { %v78_v25 = vpop.permute.xlu0 %77 }
  0x8f   :  { %vm82_vm2 = vcmp.eq.s32.totalorder %v75_v24, %v78_v25  ;;  %v352_v25 = vunpack.c.0.s8 %v351_v21 }
  0x90   :  { %v2735_v26 = vsel %vm82_vm2, 1.0, %v3396_v22 }
  0x91   :  { %2963 = vmatprep.mubr.msk.f32.mxu0 %vm102_vm1, %v2735_v26  ;;  %v354_v26 = vshrl.u32 %v74_v23, 7 }
  0x92   :  { %v81_v27 = vpop.permute.xlu0 %80 }
  0x93   :  { %vm83_vm3 = vcmp.eq.s32.totalorder %v75_v24, %v81_v27  ;;  %v245_v24 = vmul.f32 -10000.0, %v244_v19 }
  0x94   :  { %v2736_v28 = vsel %vm83_vm3, 1.0, %v3396_v22 }
  0x95   :  { %2964 = vmatmul.mubr.msk.f32.vlgmr.msra.gmra.mrb[0].mxu0 %vm102_vm1, %v2736_v28  ;;  %v247_v27 = vrot.slane %v245_v24, 6  ;;  %v355_v28 = vsub.s32 %v352_v25, %v354_v26 }
  0x96   :  { %2979 = vmatprep.mubr.msk.f32.mxu0 %vm3397_vm5, %v3396_v22 }
 0x168   :  { %v2965_v30 = vpop.f32.mrb[0].mxu0 }
 0x169   :  { %v179_v31 = vpop.f32.mrb[1].mxu0  ;;  %v185_v33 = vadd.f32 %v2965_v30, %v101_v29 }
 0x16a   :  { %v180_v34 = vadd.f32 %v179_v31, %v101_v29  ;;  %v250_v29 = vsel %vm249_vm7, %v245_v24, %v247_v27 }
 0x16b   :  { %v196_v37 = vadd.f32 %v2740_v32, %v185_v33  ;;  %v356_v30 = vrot.slane %v250_v29, %v355_v28 }
 0x16c   :  { %v195_v35 = vadd.f32 %v2740_v32, %v180_v34  ;;  %v376_v32 = vsub.s32 0, %v354_v26 }
 0x16d   :  { %v203_v38 = vsel %vm199_vm4, %v196_v37, 0.0  ;;  %v357_v31 = vcombine.high %v356_v30, %v356_v30 }
 0x16e   :  { %v200_v36 = vsel %vm199_vm4, %v195_v35, 0.0 }
 0x16f   :  { %201 = vadd.xlane.f32.xlu1 %v200_v36  ;;  %v371_v33 = vrot.slane %v357_v31, %v355_v28 }
 0x171   :  { %v3664_v34 = vrot.slane %v371_v33, %v376_v32 }
 0x173   :  { %204 = vadd.xlane.f32.xlu1 %v203_v38 }
 0x1fc   :  { %v202_v39 = vpop.xlane.xlu1 %201 }
 0x1fd   :  { %v207_v40 = vmul.f32 0.03125, %v202_v39 }
 0x1ff   :  { %v209_v41 = vsub.f32 %v195_v35, %v207_v40  ;;  %v364_v35 = vrot.slane %v356_v30, %v355_v28 }
 0x200   :  { %v205_v42 = vpop.xlane.xlu1 %204 }
 0x201   :  { %v208_v43 = vmul.f32 0.03125, %v205_v42  ;;  %v211_v44 = vmul.f32 %v209_v41, %v209_v41  ;;  %v3667_v39 = vrot.slane %v364_v35, %v376_v32 }
 0x203   :  { %v210_v45 = vsub.f32 %v196_v37, %v208_v43  ;;  %v213_v46 = vsel %vm199_vm4, %v211_v44, 0.0  ;;  %v372_v44 = vcombine.high %v364_v35, %v364_v35 }
 0x204   :  { %214 = vadd.xlane.f32.xlu0 %v213_v46  ;;  %v373_v46 = vcombine.high %v371_v33, %v371_v33  ;;  %v1059_v33 = vld [vmem:[%s4025_s9 + $0x8] sm:$0xff] }
 0x205   :  { %v212_v47 = vmul.f32 %v210_v45, %v210_v45 }
 0x206   :  { %v3675_v50 = vrot.slane %v373_v46, %v376_v32 }
 0x207   :  { %v216_v48 = vsel %vm199_vm4, %v212_v47, 0.0 }
 0x208   :  { %217 = vadd.xlane.f32.xlu1 %v216_v48 }
 0x291   :  { %v215_v55 = vpop.xlane.xlu0 %214 }
 0x292   :  { %v219_v56 = vmul.f32 0.03125, %v215_v55 }
 0x294   :  { %v221_v57 = vadd.f32 1e-12, %v219_v56 }
 0x295   :  { %v218_v58 = vpop.xlane.xlu1 %217 }
 0x296   :  { %3285 = vrsqrt.f32 %v221_v57  ;;  %v220_v59 = vmul.f32 0.03125, %v218_v58 }
 0x298   :  { %v222_v60 = vadd.f32 1e-12, %v220_v59 }
 0x29a   :  { %3287 = vrsqrt.f32 %v222_v60 }
 0x2a0   :  { %v3286_v61 = vpop.eup %3285 }
 0x2a1   :  { %v225_v63 = vmul.f32 %v3286_v61, %v209_v41 }
 0x2a3   :  { %v233_v1 = vmul.f32 %v2741_v62, %v225_v63 }
 0x2a4   :  { %v3288_v2 = vpop.eup %3287 }
 0x2a5   :  { %v226_v3 = vmul.f32 %v3288_v2, %v210_v45  ;;  %v3601_v4 = vadd.f32 %v2742_v0, %v233_v1  ;;  %v3672_v45 = vrot.slane %v372_v44, %v376_v32  ;;  %v1058_v32 = vld [vmem:[%s4025_s9] sm:$0xff] }
 0x2a6   :  { %v3193_v35 = vpack.c.bf16 %v1059_v33, %v1058_v32  ;;  %v1306_v32 = vld [vmem:[%s4031_s15] sm:$0xff]  ;;  %v1307_v33 = vld [vmem:[%s4031_s15 + $0x8] sm:$0xff] }
 0x2a7   :  { %v234_v5 = vmul.f32 %v2741_v62, %v226_v3  ;;  %2974 = vmatprep.mubr.msk.f32.mxu1 %vm199_vm4, %v3601_v4 }
 0x2a9   :  { %v3605_v6 = vadd.f32 %v2742_v0, %v234_v5 }
 0x2ab   :  { %2975 = vmatmul.mubr.msk.f32.vlgmr.msra.gmra.mrb[0].mxu1 %vm199_vm4, %v3605_v6 }
 0x2ac   :  { %2984 = vmatprep.mubr.msk.f32.mxu1 %vm3397_vm5, %v3396_v22 }
 0x37e   :  { %v2976_v8 = vpop.f32.mrb[0].mxu1 }
 0x37f   :  { %v334_v9 = vpop.f32.mrb[1].mxu1  ;;  %v3620_v11 = vadd.f32 %v2976_v8, %v2743_v7 }
 0x380   :  { %v3616_v10 = vadd.f32 %v2743_v7, %v334_v9 }
 0x382   :  { %345 = vrot.lane.b32.xlu1 %v3616_v10, %s3398_s6 }
 0x386   :  { %347 = vrot.lane.b32.xlu1 %v3620_v11, %s3398_s6 }
 0x38a   :  { %471 = vrot.lane.b32.xlu1 %v3620_v11, %s3399_s25 }
 0x38e   :  { %394 = vrot.lane.b32.xlu1 %v3616_v10, %s3399_s25 }
 0x3f4   :  { %v3628_v12 = vpop.permute.xlu1 %345 }
 0x3f5   :  { %547 = vrot.lane.b32.xlu0 %v3628_v12, %s3399_s25 }
 0x3f8   :  { %v3632_v13 = vpop.permute.xlu1 %347 }
 0x3f9   :  { %623 = vrot.lane.b32.xlu1 %v3632_v13, %s3399_s25 }
 0x3fc   :  { %v472_v14 = vpop.permute.xlu1 %471 }
 0x3fd   :  { %2983 = vmatpush3.xpose.msk.msra.mxu1 %vm396_vm6, %v472_v14 }
 0x3fe   :  { %2987 = vmatprep.subr.mxu1 %v3396_v22 }
 0x400   :  { %2985 = vmatmul.mubr.msk.f32.vlgmr.msra.gmra.mrb[2].mxu1 %vm396_vm6, %v3620_v11  ;;  %v395_v15 = vpop.permute.xlu1 %394 }
 0x401   :  { %2978 = vmatpush3.xpose.msk.msra.mxu0 %vm396_vm6, %v395_v15  ;;  %2989 = vmatprep.mubr.msk.f32.mxu1 %vm3397_vm5, %v3396_v22 }
 0x402   :  { %3002 = vmatprep.subr.mxu0 %v3396_v22 }
 0x404   :  { %2980 = vmatmul.mubr.msk.f32.vlgmr.msra.gmra.mrb[2].mxu0 %vm396_vm6, %v3616_v10 }
 0x405   :  { %3004 = vmatprep.mubr.msk.f32.mxu0 %vm3397_vm5, %v3396_v22 }
 0x467   :  { %v548_v16 = vpop.permute.xlu0 %547 }
 0x468   :  { %2988 = vmatpush3.xpose.msk.msra.mxu1 %vm396_vm6, %v548_v16 }
 0x469   :  { %2992 = vmatprep.subr.mxu1 %v3396_v22 }
 0x46b   :  { %2990 = vmatmul.mubr.msk.f32.vlgmr.msra.gmra.mrb[4].mxu1 %vm396_vm6, %v3628_v12  ;;  %v624_v17 = vpop.permute.xlu1 %623 }
 0x46c   :  { %2993 = vmatpush3.xpose.msk.msra.mxu1 %vm396_vm6, %v624_v17  ;;  %2994 = vmatprep.mubr.msk.f32.mxu1 %vm3397_vm5, %v3396_v22 }
 0x46d   :  { %2997 = vmatprep.subr.mxu1 %v3396_v22 }
 0x46f   :  { %2995 = vmatmul.mubr.msk.f32.vlgmr.msra.gmra.mrb[6].mxu1 %vm396_vm6, %v3632_v13 }
 0x470   :  { %2999 = vmatprep.mubr.msk.f32.mxu1 %vm3397_vm5, %v3396_v22 }
 0x4d3   :  { %v543_v36 = vpop.f32.mrb[2].mxu1 }
 0x4d4   :  { %v544_v37 = vadd.f32 %v543_v36, %v3664_v34  ;;  %v2986_v38 = vpop.f32.mrb[3].mxu1 }
 0x4d5   :  { %v1060_v38 = vld [vmem:[%s4025_s9 + $0x10] sm:$0xff] }
 0x4d6   :  { %v703_v23 = vsel %vm699_vm8, %v544_v37, -inf }
 0x4d7   :  { %704 = vmax.xlane.f32.xlu0 %v703_v23  ;;  %v467_v40 = vpop.f32.mrb[2].mxu0  ;;  %v1061_v23 = vld [vmem:[%s4025_s9 + $0x18] sm:$0xff] }
 0x4d8   :  { %v468_v41 = vadd.f32 %v467_v40, %v3667_v39  ;;  %v2981_v42 = vpop.f32.mrb[3].mxu0  ;;  %v3197_v40 = vpack.c.bf16 %v1061_v23, %v1060_v38  ;;  %v1310_v23 = vld [vmem:[%s4031_s15 + $0x20] sm:$0xff] }
 0x4da   :  { %v700_v43 = vsel %vm699_vm8, %v468_v41, -inf }
 0x4db   :  { %701 = vmax.xlane.f32.xlu1 %v700_v43 }
 0x53e   :  { %v619_v47 = vpop.f32.mrb[4].mxu1 }
 0x53f   :  { %v620_v48 = vadd.f32 %v619_v47, %v3672_v45  ;;  %v2991_v49 = vpop.f32.mrb[5].mxu1 }
 0x541   :  { %v706_v51 = vsel %vm699_vm8, %v620_v48, -inf }
 0x542   :  { %707 = vmax.xlane.f32.xlu1 %v706_v51  ;;  %v695_v52 = vpop.f32.mrb[6].mxu1 }
 0x543   :  { %v696_v53 = vadd.f32 %v695_v52, %v3675_v50  ;;  %v2996_v54 = vpop.f32.mrb[7].mxu1 }
 0x545   :  { %v709_v55 = vsel %vm699_vm8, %v696_v53, -inf }
 0x546   :  { %710 = vmax.xlane.f32.xlu1 %v709_v55 }
 0x557   :  { %744 = vrot.lane.b32.xlu1 %v3616_v10, %s3401_s3 }
 0x564   :  { %v705_v56 = vpop.xlane.xlu0 %704 }
 0x565   :  { %v713_v57 = vsub.f32 %v544_v37, %v705_v56 }
 0x567   :  { %v718_v58 = vmul.f32 1.442695, %v713_v57 }
 0x568   :  { %v702_v59 = vpop.xlane.xlu1 %701 }
 0x569   :  { %3289 = vpow2.f32 %v718_v58  ;;  %v712_v60 = vsub.f32 %v468_v41, %v702_v59 }
 0x56b   :  { %v716_v61 = vmul.f32 1.442695, %v712_v60 }
 0x56d   :  { %3291 = vpow2.f32 %v716_v61 }
 0x573   :  { %v3290_v62 = vpop.eup %3289 }
 0x574   :  { %v727_v63 = vsel %vm699_vm8, %v3290_v62, 0.0 }
 0x575   :  { %728 = vadd.xlane.f32.xlu0 %v727_v63 }
 0x577   :  { %v3292_v0 = vpop.eup %3291 }
 0x578   :  { %v724_v1 = vsel %vm699_vm8, %v3292_v0, 0.0 }
 0x57b   :  { %725 = vadd.xlane.f32.xlu1 %v724_v1 }
 0x5cf   :  { %v708_v2 = vpop.xlane.xlu1 %707 }
 0x5d0   :  { %v714_v3 = vsub.f32 %v620_v48, %v708_v2 }
 0x5d2   :  { %v720_v5 = vmul.f32 1.442695, %v714_v3 }
 0x5d3   :  { %v711_v7 = vpop.xlane.xlu1 %710 }
 0x5d4   :  { %3293 = vpow2.f32 %v720_v5  ;;  %v715_v8 = vsub.f32 %v696_v53, %v711_v7  ;;  %v2758_v53 = vld [vmem:[%s4026_s10] ss:$0 sm:$0xff] }
 0x5d6   :  { %v722_v9 = vmul.f32 1.442695, %v715_v8 }
 0x5d7   :  { %v745_v10 = vpop.permute.xlu1 %744 }
 0x5d8   :  { %3295 = vpow2.f32 %v722_v9  ;;  %2998 = vmatpush3.msra.mxu1 %v745_v10  ;;  %v1197_v9 = vld [vmem:[%s4029_s13 + $0x8] sm:$0xff] }
 0x5d9   :  { %3007 = vmatprep.subr.mxu1 %v3396_v22 }
 0x5de   :  { %v3294_v14 = vpop.eup %3293 }
 0x5df   :  { %v730_v15 = vsel %vm699_vm8, %v3294_v14, 0.0 }
 0x5e0   :  { %731 = vadd.xlane.f32.xlu1 %v730_v15  ;;  %v1199_v15 = vld [vmem:[%s4029_s13 + $0x18] sm:$0xff] }
 0x5e2   :  { %v3296_v16 = vpop.eup %3295 }
 0x5e3   :  { %v733_v17 = vsel %vm699_vm8, %v3296_v16, 0.0 }
 0x5e4   :  { %734 = vadd.xlane.f32.xlu0 %v733_v17 }
 0x5f1   :  { %896 = vrot.lane.b32.xlu1 %v3628_v12, %s3401_s3 }
 0x5f5   :  { %972 = vrot.lane.b32.xlu1 %v3632_v13, %s3401_s3 }
 0x5fa   :  { %820 = vrot.lane.b32.xlu0 %v3620_v11, %s3401_s3 }
 0x602   :  { %v729_v21 = vpop.xlane.xlu0 %728 }
 0x608   :  { %v726_v18 = vpop.xlane.xlu1 %725 }
 0x609   :  { %3297 = vrcp.f32 %v726_v18 }
 0x60a   :  { %3299 = vrcp.f32 %v729_v21 }
 0x613   :  { %v3298_v19 = vpop.eup %3297 }
 0x614   :  { %v737_v20 = vmul.f32 %v3298_v19, %v3292_v0  ;;  %v3300_v26 = vpop.eup %3299 }
 0x615   :  { %v739_v13 = vmul.f32 %v3300_v26, %v3290_v62 }
 0x616   :  { %3000 = vmatmul.mubr.msk.f32.vlgmr.msra.gmra.mrb[8].mxu1 %vm699_vm8, %v737_v20 }
 0x617   :  { %3009 = vmatprep.mubr.msk.f32.mxu1 %vm3397_vm5, %v3396_v22 }
 0x66d   :  { %v732_v24 = vpop.xlane.xlu1 %731 }
 0x66e   :  { %3301 = vrcp.f32 %v732_v24 }
 0x671   :  { %v735_v12 = vpop.xlane.xlu0 %734  ;;  %v897_v25 = vpop.permute.xlu1 %896 }
 0x672   :  { %3303 = vrcp.f32 %v735_v12  ;;  %3008 = vmatpush3.msra.mxu1 %v897_v25  ;;  %v2761_v25 = vld [vmem:[%s4027_s11] ss:$0 sm:$0xff] }
 0x673   :  { %3194 = vmatprep.subr.bf16.mxu1 %v3193_v35 }
 0x675   :  { %v821_v11 = vpop.permute.xlu0 %820  ;;  %v973_v27 = vpop.permute.xlu1 %972 }
 0x676   :  { %3003 = vmatpush3.msra.mxu0 %v821_v11 }
 0x677   :  { %3005 = vmatmul.mubr.msk.f32.vlgmr.msra.gmra.mrb[4].mxu0 %vm699_vm8, %v739_v13  ;;  %3012 = vmatprep.subr.mxu0 %v3396_v22  ;;  %v2762_v13 = vld [vmem:[%s4028_s12] ss:$0 sm:$0xff] }
 0x678   :  { %v3302_v28 = vpop.eup %3301  ;;  %3013 = vmatpush3.msra.mxu0 %v973_v27  ;;  %3014 = vmatprep.mubr.msk.f32.mxu0 %vm3397_vm5, %v3396_v22 }
 0x679   :  { %v741_v29 = vmul.f32 %v3302_v28, %v3294_v14  ;;  %v1198_v14 = vld [vmem:[%s4029_s13 + $0x10] sm:$0xff] }
 0x67b   :  { %3010 = vmatmul.mubr.msk.f32.vlgmr.msra.gmra.mrb[10].mxu1 %vm699_vm8, %v741_v29 }
 0x67c   :  { %v3304_v30 = vpop.eup %3303  ;;  %3196 = vmatpush3.bf16.msra.mxu1 %v3193_v35  ;;  %v3209_v35 = vpack.c.bf16 %v1307_v33, %v1306_v32 }
 0x67d   :  { %v743_v31 = vmul.f32 %v3304_v30, %v3296_v16  ;;  %3198 = vmatprep.subr.bf16.mxu1 %v3197_v40  ;;  %v3205_v16 = vpack.c.bf16 %v1199_v15, %v1198_v14 }
 0x67f   :  { %3015 = vmatmul.mubr.msk.f32.vlgmr.msra.gmra.mrb[6].mxu0 %vm699_vm8, %v743_v31 }
 0x680   :  { %3200 = vmatpush3.bf16.msra.mxu1 %v3197_v40  ;;  %v1311_v40 = vld [vmem:[%s4031_s15 + $0x28] sm:$0xff] }
 0x681   :  { %3210 = vmatprep.subr.bf16.mxu1 %v3209_v35 }
 0x6e9   :  { %v816_v36 = vpop.f32.mrb[8].mxu1 }
 0x6ea   :  { %v3001_v37 = vpop.f32.mrb[9].mxu1 }
 0x6eb   :  { %v1309_v37 = vld [vmem:[%s4031_s15 + $0x18] sm:$0xff] }
 0x74a   :  { %v892_v41 = vpop.f32.mrb[4].mxu0 }
 0x74b   :  { %v3006_v42 = vpop.f32.mrb[5].mxu0 }
 0x74c   :  { %v1312_v42 = vld [vmem:[%s4031_s15 + $0x30] sm:$0xff] }
 0x74e   :  { %v968_v43 = vpop.f32.mrb[10].mxu1 }
 0x74f   :  { %1050 = vrot.lane.b32.xlu0 %v968_v43, %s3402_s24  ;;  %v3011_v44 = vpop.f32.mrb[11].mxu1  ;;  %v1313_v43 = vld [vmem:[%s4031_s15 + $0x38] sm:$0xff] }
 0x750   :  { %v3221_v44 = vpack.c.bf16 %v1313_v43, %v1312_v42 }
 0x752   :  { %v1044_v46 = vpop.f32.mrb[6].mxu0 }
 0x753   :  { %1052 = vrot.lane.b32.xlu1 %v1044_v46, %s3402_s24  ;;  %v3016_v47 = vpop.f32.mrb[7].mxu0  ;;  %v2763_v46 = vld [vmem:[%s4030_s14] ss:$0 sm:$0xff] }
 0x7c1   :  { %v1051_v48 = vpop.permute.xlu0 %1050 }
 0x7c2   :  { %v1056_v49 = vsel %vm396_vm6, %v816_v36, %v1051_v48  ;;  %v1308_v36 = vld [vmem:[%s4031_s15 + $0x10] sm:$0xff] }
 0x7c3   :  { %3025 = vmatprep.mubr.msk.f32.mxu1 %vm199_vm4, %v1056_v49  ;;  %v3213_v38 = vpack.c.bf16 %v1309_v37, %v1308_v36 }
 0x7c5   :  { %v1053_v51 = vpop.permute.xlu1 %1052 }
 0x7c6   :  { %v1057_v52 = vsel %vm396_vm6, %v892_v41, %v1053_v51  ;;  %v3217_v41 = vpack.c.bf16 %v1311_v40, %v1310_v23 }
 0x7c7   :  { %3026 = vmatmul.mubr.msk.f32.vlgmr.msra.gmra.mrb[12].mxu1 %vm199_vm4, %v1057_v52 }
 0x7c8   :  { %3212 = vmatpush3.bf16.msra.mxu1 %v3209_v35 }
 0x7c9   :  { %3214 = vmatprep.subr.bf16.mxu1 %v3213_v38 }
 0x7cc   :  { %3216 = vmatpush3.bf16.msra.mxu1 %v3213_v38 }
 0x7cd   :  { %3218 = vmatprep.subr.bf16.mxu1 %v3217_v41 }
 0x7d0   :  { %3220 = vmatpush3.bf16.msra.mxu1 %v3217_v41  ;;  %v2769_v41 = vld [vmem:[%s4033_s17] ss:$0 sm:$0xff] }
 0x7d1   :  { %3222 = vmatprep.subr.bf16.mxu1 %v3221_v44 }
 0x7d4   :  { %3224 = vmatpush3.bf16.msra.mxu1 %v3221_v44 }
 0x7d5   :  { %3079 = vmatprep.subr.mxu1 %v3396_v22 }
 0x89a   :  { %v3027_v54 = vpop.f32.mrb[12].mxu1 }
 0x89b   :  { %v1147_v55 = vadd.f32 %v3027_v54, %v2758_v53  ;;  %v1141_v56 = vpop.f32.mrb[13].mxu1 }
 0x89c   :  { %v1142_v57 = vadd.f32 %v2758_v53, %v1141_v56 }
 0x89d   :  { %v1151_v58 = vadd.f32 %v1147_v55, %v3605_v6 }
 0x89e   :  { %v1150_v59 = vadd.f32 %v1142_v57, %v3601_v4  ;;  %v1196_v4 = vld [vmem:[%s4029_s13] sm:$0xff] }
 0x89f   :  { %v1157_v60 = vsel %vm199_vm4, %v1151_v58, 0.0  ;;  %v3201_v10 = vpack.c.bf16 %v1197_v9, %v1196_v4 }
 0x8a0   :  { %1158 = vadd.xlane.f32.xlu1 %v1157_v60  ;;  %v1154_v61 = vsel %vm199_vm4, %v1150_v59, 0.0 }
 0x8a1   :  { %1155 = vadd.xlane.f32.xlu0 %v1154_v61  ;;  %3202 = vmatprep.subr.bf16.mxu0 %v3201_v10 }
 0x8a2   :  { %3204 = vmatpush3.bf16.msra.mxu0 %v3201_v10 }
 0x8a3   :  { %3206 = vmatprep.subr.bf16.mxu0 %v3205_v16 }
 0x8a6   :  { %3208 = vmatpush3.bf16.msra.mxu0 %v3205_v16 }
 0x92d   :  { %v1159_v62 = vpop.xlane.xlu1 %1158 }
 0x92e   :  { %v1161_v63 = vmul.f32 0.03125, %v1159_v62  ;;  %v1156_v0 = vpop.xlane.xlu0 %1155 }
 0x92f   :  { %v1160_v1 = vmul.f32 0.03125, %v1156_v0 }
 0x930   :  { %v1163_v2 = vsub.f32 %v1151_v58, %v1161_v63 }
 0x931   :  { %v1162_v3 = vsub.f32 %v1150_v59, %v1160_v1 }
 0x932   :  { %v1165_v8 = vmul.f32 %v1163_v2, %v1163_v2 }
 0x933   :  { %v1164_v5 = vmul.f32 %v1162_v3, %v1162_v3 }
 0x934   :  { %v1169_v6 = vsel %vm199_vm4, %v1165_v8, 0.0  ;;  %v2766_v8 = vld [vmem:[%s4032_s16] ss:$0 sm:$0xff] }
 0x935   :  { %v1166_v7 = vsel %vm199_vm4, %v1164_v5, 0.0 }
 0x936   :  { %1167 = vadd.xlane.f32.xlu0 %v1166_v7 }
 0x93a   :  { %1170 = vadd.xlane.f32.xlu0 %v1169_v6 }
 0x9c3   :  { %v1168_v17 = vpop.xlane.xlu0 %1167 }
 0x9c4   :  { %v1172_v18 = vmul.f32 0.03125, %v1168_v17 }
 0x9c6   :  { %v1174_v19 = vadd.f32 1e-12, %v1172_v18 }
 0x9c7   :  { %v1171_v20 = vpop.xlane.xlu0 %1170 }
 0x9c8   :  { %3305 = vrsqrt.f32 %v1174_v19  ;;  %v1173_v21 = vmul.f32 0.03125, %v1171_v20 }
 0x9ca   :  { %v1175_v24 = vadd.f32 1e-12, %v1173_v21 }
 0x9cc   :  { %3307 = vrsqrt.f32 %v1175_v24 }
 0x9d2   :  { %v3306_v12 = vpop.eup %3305 }
 0x9d3   :  { %v1178_v26 = vmul.f32 %v3306_v12, %v1162_v3 }
 0x9d5   :  { %v1186_v11 = vmul.f32 %v2761_v25, %v1178_v26 }
 0x9d6   :  { %v3308_v27 = vpop.eup %3307 }
 0x9d7   :  { %v1179_v28 = vmul.f32 %v3308_v27, %v1163_v2  ;;  %v1194_v29 = vadd.f32 %v2762_v13, %v1186_v11  ;;  %v2771_v27 = vld [vmem:[%s4023_s7 + $0x20] sm:$0xff] }
 0x9d9   :  { %v1187_v30 = vmul.f32 %v2761_v25, %v1179_v28  ;;  %3036 = vmatprep.mubr.msk.f32.mxu0 %vm199_vm4, %v1194_v29  ;;  %v2772_v28 = vld [vmem:[%s4023_s7 + $0x28] sm:$0xff] }
 0x9db   :  { %v1195_v31 = vadd.f32 %v2762_v13, %v1187_v30  ;;  %v2773_v30 = vld [vmem:[%s4023_s7 + $0x30] sm:$0xff] }
 0x9dd   :  { %3037 = vmatmul.mubr.msk.f32.vlgmr.msra.gmra.mrb[8].mxu0 %vm199_vm4, %v1195_v31 }
 0xab0   :  { %v3038_v47 = vpop.f32.mrb[8].mxu0 }
 0xab1   :  { %v1285_v48 = vadd.f32 %v3038_v47, %v2763_v46  ;;  %v1279_v49 = vpop.f32.mrb[9].mxu0 }
 0xab2   :  { %v1280_v51 = vadd.f32 %v2763_v46, %v1279_v49  ;;  %v2770_v46 = vld [vmem:[%s4034_s18] ss:$0 sm:$0xff] }
 0xab3   :  { %v1289_v52 = vmul.f32 %v1285_v48, %v1285_v48 }
 0xab4   :  { %v1288_v53 = vmul.f32 %v1280_v51, %v1280_v51 }
 0xab5   :  { %v1291_v54 = vmul.f32 %v1289_v52, %v1285_v48  ;;  %v2776_v52 = vld [vmem:[%s4024_s8 + $0x1] ss:$0 sm:$0xff] }
 0xab6   :  { %v1290_v55 = vmul.f32 %v1288_v53, %v1280_v51 }
 0xab7   :  { %v1293_v56 = vmul.f32 0.044715, %v1291_v54 }
 0xab8   :  { %v1292_v57 = vmul.f32 0.044715, %v1290_v55 }
 0xab9   :  { %v1295_v58 = vadd.f32 %v1293_v56, %v1285_v48 }
 0xaba   :  { %v1294_v59 = vadd.f32 %v1292_v57, %v1280_v51 }
 0xabb   :  { %v1297_v60 = vmul.f32 0.7978846, %v1295_v58 }
 0xabc   :  { %v1296_v61 = vmul.f32 0.7978846, %v1294_v59 }
 0xabd   :  { %3309 = vtanh.f32 %v1297_v60 }
 0xabe   :  { %3311 = vtanh.f32 %v1296_v61 }
 0xac7   :  { %v3310_v62 = vpop.eup %3309 }
 0xac8   :  { %v3312_v63 = vpop.eup %3311  ;;  %v1301_v0 = vadd.f32 1.0, %v3310_v62 }
 0xac9   :  { %v1300_v1 = vadd.f32 1.0, %v3312_v63 }
 0xaca   :  { %v1303_v2 = vmul.f32 0.5, %v1301_v0 }
 0xacb   :  { %v1302_v3 = vmul.f32 0.5, %v1300_v1 }
 0xacc   :  { %v1305_v7 = vmul.f32 %v1303_v2, %v1285_v48 }
 0xacd   :  { %v1304_v5 = vmul.f32 %v1302_v3, %v1280_v51 }
 0xacf   :  { %3055 = vmatprep.mubr.msk.f32.mxu1 %vm1321_vm9, %v1304_v5 }
 0xad0   :  { %3056 = vmatmul.mubr.msk.f32.vlgmr.msra.gmra.mrb[14].mxu1 %vm1321_vm9, %v1305_v7 }
 0xad1   :  { %3081 = vmatprep.mubr.msk.f32.mxu1 %vm3397_vm5, %v3396_v22 }
 0xba3   :  { %v3057_v6 = vpop.f32.mrb[14].mxu1 }
 0xba4   :  { %v1400_v4 = vadd.f32 %v3057_v6, %v2766_v8  ;;  %v1394_v9 = vpop.f32.mrb[15].mxu1 }
 0xba5   :  { %v1395_v10 = vadd.f32 %v2766_v8, %v1394_v9 }
 0xba6   :  { %v1404_v14 = vadd.f32 %v1400_v4, %v1195_v31  ;;  %v2774_v31 = vld [vmem:[%s4023_s7 + $0x38] sm:$0xff] }
 0xba7   :  { %v1403_v15 = vadd.f32 %v1395_v10, %v1194_v29  ;;  %v3225_v29 = vpack.c.bf16 %v2772_v28, %v2771_v27  ;;  %v3229_v32 = vpack.c.bf16 %v2774_v31, %v2773_v30 }
 0xba8   :  { %v1410_v16 = vsel %vm199_vm4, %v1404_v14, 0.0 }
 0xba9   :  { %1411 = vadd.xlane.f32.xlu0 %v1410_v16  ;;  %v1407_v17 = vsel %vm199_vm4, %v1403_v15, 0.0  ;;  %3226 = vmatprep.subr.bf16.mxu0 %v3225_v29 }
 0xbaa   :  { %1408 = vadd.xlane.f32.xlu1 %v1407_v17  ;;  %3228 = vmatpush3.bf16.msra.mxu0 %v3225_v29 }
 0xbab   :  { %3230 = vmatprep.subr.bf16.mxu0 %v3229_v32 }
 0xbae   :  { %3232 = vmatpush3.bf16.msra.mxu0 %v3229_v32 }
 0xbaf   :  { %3069 = vmatprep.subr.mxu0 %v3396_v22 }
 0xc36   :  { %v1412_v18 = vpop.xlane.xlu0 %1411 }
 0xc37   :  { %v1414_v19 = vmul.f32 0.03125, %v1412_v18  ;;  %v1409_v20 = vpop.xlane.xlu1 %1408 }
 0xc38   :  { %v1413_v21 = vmul.f32 0.03125, %v1409_v20 }
 0xc39   :  { %v1416_v24 = vsub.f32 %v1404_v14, %v1414_v19 }
 0xc3a   :  { %v1415_v12 = vsub.f32 %v1403_v15, %v1413_v21 }
 0xc3b   :  { %v1418_v25 = vmul.f32 %v1416_v24, %v1416_v24 }
 0xc3c   :  { %v1417_v26 = vmul.f32 %v1415_v12, %v1415_v12 }
 0xc3d   :  { %v1422_v13 = vsel %vm199_vm4, %v1418_v25, 0.0 }
 0xc3e   :  { %1423 = vadd.xlane.f32.xlu0 %v1422_v13  ;;  %v1419_v11 = vsel %vm199_vm4, %v1417_v26, 0.0 }
 0xc3f   :  { %1420 = vadd.xlane.f32.xlu1 %v1419_v11 }
 0xccb   :  { %v1424_v33 = vpop.xlane.xlu0 %1423 }
 0xccc   :  { %v1426_v35 = vmul.f32 0.03125, %v1424_v33  ;;  %v1421_v36 = vpop.xlane.xlu1 %1420 }
 0xccd   :  { %v1425_v37 = vmul.f32 0.03125, %v1421_v36 }
 0xcce   :  { %v1428_v38 = vadd.f32 1e-12, %v1426_v35 }
 0xccf   :  { %v1427_v23 = vadd.f32 1e-12, %v1425_v37 }
 0xcd0   :  { %3313 = vrsqrt.f32 %v1428_v38 }
 0xcd1   :  { %3315 = vrsqrt.f32 %v1427_v23 }
 0xcda   :  { %v3314_v40 = vpop.eup %3313 }
 0xcdb   :  { %v3316_v42 = vpop.eup %3315  ;;  %v1432_v43 = vmul.f32 %v3314_v40, %v1416_v24 }
 0xcdc   :  { %v1431_v44 = vmul.f32 %v3316_v42, %v1415_v12 }
 0xcdd   :  { %v1440_v47 = vmul.f32 %v2769_v41, %v1432_v43 }
 0xcde   :  { %v1439_v48 = vmul.f32 %v2769_v41, %v1431_v44 }
 0xcdf   :  { %v3809_v51 = vadd.f32 %v2770_v46, %v1440_v47 }
 0xce0   :  { %v3807_v49 = vadd.f32 %v2770_v46, %v1439_v48 }
 0xce2   :  { %3066 = vmatprep.mubr.msk.f32.mxu0 %vm199_vm4, %v3807_v49 }
 0xce3   :  { %3067 = vmatmul.mubr.msk.f32.vlgmr.msra.gmra.mrb[10].mxu0 %vm199_vm4, %v3809_v51 }
 0xce4   :  { %3071 = vmatprep.mubr.msk.f32.mxu0 %vm3397_vm5, %v3396_v22 }
 0xdb6   :  { %v3068_v53 = vpop.f32.mrb[10].mxu0 }
 0xdb7   :  { %v3820_v54 = vadd.f32 %v3068_v53, %v2776_v52  ;;  %v1534_v55 = vpop.f32.mrb[11].mxu0 }
 0xdb8   :  { %v1535_v56 = vadd.f32 %v2776_v52, %v1534_v55  ;;  %v2792_v55 = vld [vmem:[%s4025_s9 + $0x28] sm:$0xff] }
 0xdb9   :  { %1547 = vrot.lane.b32.xlu0 %v3820_v54, %s3398_s6 }
 0xdba   :  { %1545 = vrot.lane.b32.xlu1 %v1535_v56, %s3398_s6 }
 0xdbe   :  { %1549 = vrot.lane.b32.xlu1 %v1535_v56, %s3399_s25 }
 0xdc2   :  { %1625 = vrot.lane.b32.xlu1 %v3820_v54, %s3399_s25 }
 0xe2b   :  { %v3828_v57 = vpop.permute.xlu0 %1547 }
 0xe2c   :  { %1777 = vrot.lane.b32.xlu1 %v3828_v57, %s3399_s25  ;;  %v1546_v58 = vpop.permute.xlu1 %1545 }
 0xe2d   :  { %1701 = vrot.lane.b32.xlu0 %v1546_v58, %s3399_s25 }
 0xe30   :  { %v1550_v59 = vpop.permute.xlu1 %1549 }
 0xe31   :  { %3070 = vmatpush3.xpose.msk.msra.mxu0 %vm396_vm6, %v1550_v59  ;;  %v2793_v59 = vld [vmem:[%s4025_s9 + $0x30] sm:$0xff] }
 0xe32   :  { %3074 = vmatprep.subr.mxu0 %v3396_v22 }
 0xe34   :  { %3072 = vmatmul.mubr.msk.f32.vlgmr.msra.gmra.mrb[12].mxu0 %vm396_vm6, %v1535_v56  ;;  %v1626_v60 = vpop.permute.xlu1 %1625 }
 0xe35   :  { %3075 = vmatpush3.xpose.msk.msra.mxu0 %vm396_vm6, %v1626_v60  ;;  %3076 = vmatprep.mubr.msk.f32.mxu0 %vm3397_vm5, %v3396_v22  ;;  %v2794_v60 = vld [vmem:[%s4025_s9 + $0x38] sm:$0xff] }
 0xe36   :  { %3084 = vmatprep.subr.mxu0 %v3396_v22 }
 0xe38   :  { %3077 = vmatmul.mubr.msk.f32.vlgmr.msra.gmra.mrb[14].mxu0 %vm396_vm6, %v3820_v54 }
 0xe39   :  { %3086 = vmatprep.mubr.msk.f32.mxu0 %vm3397_vm5, %v3396_v22 }
 0xe9e   :  { %v1778_v61 = vpop.permute.xlu1 %1777 }
 0xe9f   :  { %v1702_v62 = vpop.permute.xlu0 %1701  ;;  %3085 = vmatpush3.xpose.msk.msra.mxu0 %vm396_vm6, %v1778_v61  ;;  %v3237_v61 = vpack.c.bf16 %v2794_v60, %v2793_v59  ;;  %v2818_v59 = vld [vmem:[%s4031_s15 + $0x78] sm:$0xff] }
 0xea0   :  { %3080 = vmatpush3.xpose.msk.msra.mxu1 %vm396_vm6, %v1702_v62  ;;  %3094 = vmatprep.subr.mxu0 %v3396_v22 }
 0xea1   :  { %3089 = vmatprep.subr.mxu1 %v3396_v22 }
 0xea2   :  { %3087 = vmatmul.mubr.msk.f32.vlgmr.msra.gmra.mrb[16].mxu0 %vm396_vm6, %v3828_v57 }
 0xea3   :  { %3082 = vmatmul.mubr.msk.f32.vlgmr.msra.gmra.mrb[16].mxu1 %vm396_vm6, %v1546_v58  ;;  %3096 = vmatprep.mubr.msk.f32.mxu0 %vm3397_vm5, %v3396_v22 }
 0xea4   :  { %3091 = vmatprep.mubr.msk.f32.mxu1 %vm3397_vm5, %v3396_v22 }
 0xf07   :  { %v1621_v63 = vpop.f32.mrb[12].mxu0 }
 0xf08   :  { %v1622_v0 = vadd.f32 %v1621_v63, %v3667_v39  ;;  %v3073_v1 = vpop.f32.mrb[13].mxu0 }
 0xf0a   :  { %v1853_v2 = vsel %vm699_vm8, %v1622_v0, -inf }
 0xf0b   :  { %1854 = vmax.xlane.f32.xlu0 %v1853_v2  ;;  %v1697_v3 = vpop.f32.mrb[14].mxu0 }
 0xf0c   :  { %v1698_v5 = vadd.f32 %v1697_v3, %v3664_v34  ;;  %v3078_v7 = vpop.f32.mrb[15].mxu0 }
 0xf0e   :  { %v1856_v8 = vsel %vm699_vm8, %v1698_v5, -inf }
 0xf0f   :  { %1857 = vmax.xlane.f32.xlu1 %v1856_v8 }
 0xf20   :  { %1897 = vrot.lane.b32.xlu1 %v1535_v56, %s3401_s3 }
 0xf75   :  { %v1849_v6 = vpop.f32.mrb[16].mxu0 }
 0xf76   :  { %v1773_v4 = vpop.f32.mrb[16].mxu1  ;;  %v3088_v9 = vpop.f32.mrb[17].mxu0  ;;  %v1850_v39 = vadd.f32 %v1849_v6, %v3675_v50 }
 0xf77   :  { %v1774_v10 = vadd.f32 %v1773_v4, %v3672_v45  ;;  %v3083_v14 = vpop.f32.mrb[17].mxu1  ;;  %v2796_v4 = vld [vmem:[%s4026_s10 + $0x1] ss:$0 sm:$0xff] }
 0xf78   :  { %v1862_v16 = vsel %vm699_vm8, %v1850_v39, -inf }
 0xf79   :  { %v1859_v15 = vsel %vm699_vm8, %v1774_v10, -inf }
 0xf7a   :  { %1860 = vmax.xlane.f32.xlu0 %v1859_v15 }
 0xf7e   :  { %1863 = vmax.xlane.f32.xlu0 %v1862_v16 }
 0xf98   :  { %v1855_v34 = vpop.xlane.xlu0 %1854 }
 0xf99   :  { %v1865_v17 = vsub.f32 %v1622_v0, %v1855_v34 }
 0xf9b   :  { %v1869_v18 = vmul.f32 1.442695, %v1865_v17 }
 0xf9c   :  { %v1858_v19 = vpop.xlane.xlu1 %1857 }
 0xf9d   :  { %3317 = vpow2.f32 %v1869_v18  ;;  %v1866_v20 = vsub.f32 %v1698_v5, %v1858_v19 }
 0xf9f   :  { %v1871_v21 = vmul.f32 1.442695, %v1866_v20 }
 0xfa0   :  { %v1898_v24 = vpop.permute.xlu1 %1897 }
 0xfa1   :  { %3319 = vpow2.f32 %v1871_v21  ;;  %3090 = vmatpush3.msra.mxu1 %v1898_v24 }
 0xfa2   :  { %3099 = vmatprep.subr.mxu1 %v3396_v22 }
 0xfa7   :  { %v3318_v45 = vpop.eup %3317 }
 0xfa8   :  { %v1877_v50 = vsel %vm699_vm8, %v3318_v45, 0.0 }
 0xfa9   :  { %1878 = vadd.xlane.f32.xlu1 %v1877_v50 }
 0xfab   :  { %v3320_v12 = vpop.eup %3319 }
 0xfac   :  { %v1880_v25 = vsel %vm699_vm8, %v3320_v12, 0.0 }
 0xfad   :  { %1881 = vadd.xlane.f32.xlu0 %v1880_v25 }
 0xfba   :  { %2049 = vrot.lane.b32.xlu1 %v1546_v58, %s3401_s3 }
0x1007   :  { %v1861_v26 = vpop.xlane.xlu0 %1860 }
0x1008   :  { %v1867_v13 = vsub.f32 %v1774_v10, %v1861_v26  ;;  %v2804_v26 = vld [vmem:[%s4029_s13 + $0x28] sm:$0xff] }
0x100a   :  { %v1873_v11 = vmul.f32 1.442695, %v1867_v13 }
0x100b   :  { %v1864_v27 = vpop.xlane.xlu0 %1863 }
0x100c   :  { %3321 = vpow2.f32 %v1873_v11  ;;  %v1868_v28 = vsub.f32 %v1850_v39, %v1864_v27  ;;  %v2805_v11 = vld [vmem:[%s4029_s13 + $0x30] sm:$0xff]  ;;  %v2806_v27 = vld [vmem:[%s4029_s13 + $0x38] sm:$0xff] }
0x100e   :  { %v1875_v29 = vmul.f32 1.442695, %v1868_v28  ;;  %v3245_v28 = vpack.c.bf16 %v2806_v27, %v2805_v11 }
0x1010   :  { %3323 = vpow2.f32 %v1875_v29 }
0x1016   :  { %v3322_v30 = vpop.eup %3321 }
0x1017   :  { %v1883_v31 = vsel %vm699_vm8, %v3322_v30, 0.0 }
0x1018   :  { %1884 = vadd.xlane.f32.xlu1 %v1883_v31 }
0x101a   :  { %v3324_v32 = vpop.eup %3323 }
0x101b   :  { %v1886_v33 = vsel %vm699_vm8, %v3324_v32, 0.0 }
0x101c   :  { %1887 = vadd.xlane.f32.xlu0 %v1886_v33 }
0x1029   :  { %2125 = vrot.lane.b32.xlu1 %v3828_v57, %s3401_s3 }
0x1032   :  { %1973 = vrot.lane.b32.xlu0 %v3820_v54, %s3401_s3  ;;  %v2791_v54 = vld [vmem:[%s4025_s9 + $0x20] sm:$0xff] }
0x1033   :  { %v3233_v56 = vpack.c.bf16 %v2792_v55, %v2791_v54  ;;  %v2814_v54 = vld [vmem:[%s4031_s15 + $0x58] sm:$0xff]  ;;  %v2815_v55 = vld [vmem:[%s4031_s15 + $0x60] sm:$0xff] }
0x1036   :  { %v1879_v35 = vpop.xlane.xlu1 %1878 }
0x1037   :  { %3325 = vrcp.f32 %v1879_v35 }
0x103a   :  { %v2050_v38 = vpop.permute.xlu1 %2049  ;;  %v1882_v23 = vpop.xlane.xlu0 %1881 }
0x103b   :  { %3327 = vrcp.f32 %v1882_v23  ;;  %v2802_v23 = vld [vmem:[%s4028_s12 + $0x1] ss:$0 sm:$0xff] }
0x1041   :  { %v3326_v36 = vpop.eup %3325 }
0x1042   :  { %v1890_v37 = vmul.f32 %v3326_v36, %v3318_v45 }
0x1044   :  { %3092 = vmatmul.mubr.msk.f32.vlgmr.msra.gmra.mrb[18].mxu1 %vm699_vm8, %v1890_v37  ;;  %v2801_v37 = vld [vmem:[%s4027_s11 + $0x1] ss:$0 sm:$0xff] }
0x1045   :  { %3100 = vmatpush3.msra.mxu1 %v2050_v38  ;;  %3101 = vmatprep.mubr.msk.f32.mxu1 %vm3397_vm5, %v3396_v22  ;;  %v3328_v42 = vpop.eup %3327 }
0x1046   :  { %v1892_v43 = vmul.f32 %v3328_v42, %v3320_v12  ;;  %3234 = vmatprep.subr.bf16.mxu1 %v3233_v56 }
0x10a5   :  { %v1885_v40 = vpop.xlane.xlu1 %1884 }
0x10a6   :  { %3329 = vrcp.f32 %v1885_v40 }
0x10a9   :  { %v1888_v41 = vpop.xlane.xlu0 %1887  ;;  %v2126_v46 = vpop.permute.xlu1 %2125 }
0x10aa   :  { %3331 = vrcp.f32 %v1888_v41 }
0x10ad   :  { %v1974_v44 = vpop.permute.xlu0 %1973 }
0x10ae   :  { %3095 = vmatpush3.msra.mxu0 %v1974_v44 }
0x10af   :  { %3097 = vmatmul.mubr.msk.f32.vlgmr.msra.gmra.mrb[18].mxu0 %vm699_vm8, %v1892_v43  ;;  %3104 = vmatprep.subr.mxu0 %v3396_v22 }
0x10b0   :  { %v3330_v47 = vpop.eup %3329  ;;  %3105 = vmatpush3.msra.mxu0 %v2126_v46  ;;  %3106 = vmatprep.mubr.msk.f32.mxu0 %vm3397_vm5, %v3396_v22 }
0x10b1   :  { %v1894_v48 = vmul.f32 %v3330_v47, %v3322_v30  ;;  %v2811_v47 = vld [vmem:[%s4031_s15 + $0x40] sm:$0xff] }
0x10b3   :  { %3102 = vmatmul.mubr.msk.f32.vlgmr.msra.gmra.mrb[20].mxu1 %vm699_vm8, %v1894_v48  ;;  %v2812_v48 = vld [vmem:[%s4031_s15 + $0x48] sm:$0xff] }
0x10b4   :  { %v3332_v52 = vpop.eup %3331  ;;  %3236 = vmatpush3.bf16.msra.mxu1 %v3233_v56  ;;  %v2816_v56 = vld [vmem:[%s4031_s15 + $0x68] sm:$0xff] }
0x10b5   :  { %v1896_v53 = vmul.f32 %v3332_v52, %v3324_v32  ;;  %3238 = vmatprep.subr.bf16.mxu1 %v3237_v61  ;;  %v3249_v52 = vpack.c.bf16 %v2812_v48, %v2811_v47 }
0x10b7   :  { %3107 = vmatmul.mubr.msk.f32.vlgmr.msra.gmra.mrb[20].mxu0 %vm699_vm8, %v1896_v53  ;;  %v2813_v53 = vld [vmem:[%s4031_s15 + $0x50] sm:$0xff] }
0x10b8   :  { %3240 = vmatpush3.bf16.msra.mxu1 %v3237_v61  ;;  %v2808_v61 = vld [vmem:[%s4030_s14 + $0x1] ss:$0 sm:$0xff] }
0x10b9   :  { %3250 = vmatprep.subr.bf16.mxu1 %v3249_v52 }
0x1117   :  { %v1969_v57 = vpop.f32.mrb[18].mxu1 }
0x1118   :  { %v3093_v58 = vpop.f32.mrb[19].mxu1 }
0x1119   :  { %v2817_v58 = vld [vmem:[%s4031_s15 + $0x70] sm:$0xff] }
0x111a   :  { %v3261_v60 = vpack.c.bf16 %v2818_v59, %v2817_v58 }
0x1182   :  { %v2045_v62 = vpop.f32.mrb[18].mxu0 }
0x1183   :  { %v3098_v63 = vpop.f32.mrb[19].mxu0 }
0x1186   :  { %v2121_v0 = vpop.f32.mrb[20].mxu1 }
0x1187   :  { %2203 = vrot.lane.b32.xlu0 %v2121_v0, %s3402_s24  ;;  %v3103_v1 = vpop.f32.mrb[21].mxu1 }
0x118a   :  { %v2197_v2 = vpop.f32.mrb[20].mxu0 }
0x118b   :  { %2205 = vrot.lane.b32.xlu1 %v2197_v2, %s3402_s24  ;;  %v3108_v3 = vpop.f32.mrb[21].mxu0 }
0x11f9   :  { %v2204_v5 = vpop.permute.xlu0 %2203 }
0x11fa   :  { %v2209_v7 = vsel %vm396_vm6, %v1969_v57, %v2204_v5  ;;  %v3257_v57 = vpack.c.bf16 %v2816_v56, %v2815_v55 }
0x11fb   :  { %3117 = vmatprep.mubr.msk.f32.mxu1 %vm199_vm4, %v2209_v7 }
0x11fd   :  { %v2206_v8 = vpop.permute.xlu1 %2205 }
0x11fe   :  { %v2210_v6 = vsel %vm396_vm6, %v2045_v62, %v2206_v8 }
0x11ff   :  { %3118 = vmatmul.mubr.msk.f32.vlgmr.msra.gmra.mrb[22].mxu1 %vm199_vm4, %v2210_v6 }
0x1200   :  { %3252 = vmatpush3.bf16.msra.mxu1 %v3249_v52 }
0x12d2   :  { %v3119_v9 = vpop.f32.mrb[22].mxu1 }
0x12d3   :  { %v2302_v10 = vadd.f32 %v3119_v9, %v2796_v4  ;;  %v2296_v14 = vpop.f32.mrb[23].mxu1 }
0x12d4   :  { %v2297_v39 = vadd.f32 %v2796_v4, %v2296_v14 }
0x12d5   :  { %v2306_v15 = vadd.f32 %v2302_v10, %v3809_v51 }
0x12d6   :  { %v2305_v16 = vadd.f32 %v2297_v39, %v3807_v49  ;;  %v2803_v49 = vld [vmem:[%s4029_s13 + $0x20] sm:$0xff] }
0x12d7   :  { %v2314_v34 = vsel %vm199_vm4, %v2306_v15, 0.0  ;;  %v3241_v13 = vpack.c.bf16 %v2804_v26, %v2803_v49 }
0x12d8   :  { %2315 = vadd.xlane.f32.xlu1 %v2314_v34  ;;  %v2311_v17 = vsel %vm199_vm4, %v2305_v16, 0.0 }
0x12d9   :  { %2312 = vadd.xlane.f32.xlu0 %v2311_v17  ;;  %3242 = vmatprep.subr.bf16.mxu0 %v3241_v13 }
0x12da   :  { %3244 = vmatpush3.bf16.msra.mxu0 %v3241_v13 }
0x12db   :  { %3246 = vmatprep.subr.bf16.mxu0 %v3245_v28 }
0x12de   :  { %3248 = vmatpush3.bf16.msra.mxu0 %v3245_v28 }
0x1365   :  { %v2316_v18 = vpop.xlane.xlu1 %2315 }
0x1366   :  { %v2318_v19 = vmul.f32 0.03125, %v2316_v18  ;;  %v2313_v20 = vpop.xlane.xlu0 %2312 }
0x1367   :  { %v2317_v21 = vmul.f32 0.03125, %v2313_v20 }
0x1368   :  { %v2320_v24 = vsub.f32 %v2306_v15, %v2318_v19 }
0x1369   :  { %v2319_v45 = vsub.f32 %v2305_v16, %v2317_v21  ;;  %v2820_v21 = vld [vmem:[%s4032_s16 + $0x1] ss:$0 sm:$0xff] }
0x136a   :  { %v2322_v25 = vmul.f32 %v2320_v24, %v2320_v24 }
0x136b   :  { %v2321_v50 = vmul.f32 %v2319_v45, %v2319_v45 }
0x136c   :  { %v2326_v51 = vsel %vm199_vm4, %v2322_v25, 0.0 }
0x136d   :  { %v2323_v12 = vsel %vm199_vm4, %v2321_v50, 0.0 }
0x136e   :  { %2324 = vadd.xlane.f32.xlu0 %v2323_v12 }
0x1372   :  { %2327 = vadd.xlane.f32.xlu0 %v2326_v51 }
0x13fb   :  { %v2325_v29 = vpop.xlane.xlu0 %2324 }
0x13fc   :  { %v2329_v30 = vmul.f32 0.03125, %v2325_v29 }
0x13fe   :  { %v2331_v31 = vadd.f32 1e-12, %v2329_v30 }
0x13ff   :  { %v2328_v32 = vpop.xlane.xlu0 %2327 }
0x1400   :  { %3333 = vrsqrt.f32 %v2331_v31  ;;  %v2330_v33 = vmul.f32 0.03125, %v2328_v32 }
0x1402   :  { %v2332_v35 = vadd.f32 1e-12, %v2330_v33 }
0x1404   :  { %3335 = vrsqrt.f32 %v2332_v35 }
0x140a   :  { %v3334_v36 = vpop.eup %3333 }
0x140b   :  { %v2335_v38 = vmul.f32 %v3334_v36, %v2319_v45  ;;  %v2618_v36 = vld [vmem:[%s4035_s19] sm:$0xff] }
0x140d   :  { %v2343_v40 = vmul.f32 %v2801_v37, %v2335_v38 }
0x140e   :  { %v3336_v41 = vpop.eup %3335 }
0x140f   :  { %v2336_v42 = vmul.f32 %v3336_v41, %v2320_v24  ;;  %v2351_v43 = vadd.f32 %v2802_v23, %v2343_v40  ;;  %v2621_v40 = vld [vmem:[%s4035_s19 + $0x18] sm:$0xff]  ;;  %v3403_v41 = vmov 0.0|0.0  }
0x1410   :  { %3265 = vmatprep.subr.bf16.mxu0 %v3403_v41 }
0x1411   :  { %v2344_v44 = vmul.f32 %v2801_v37, %v2336_v42  ;;  %3128 = vmatprep.mubr.msk.f32.mxu0 %vm199_vm4, %v2351_v43  ;;  %v2619_v37 = vld [vmem:[%s4035_s19 + $0x8] sm:$0xff] }
0x1412   :  { %v3266_v38 = vpack.c.bf16 %v2619_v37, %v2618_v36 }
0x1413   :  { %v2352_v46 = vadd.f32 %v2802_v23, %v2344_v44  ;;  %v2620_v23 = vld [vmem:[%s4035_s19 + $0x10] sm:$0xff] }
0x1414   :  { %v3269_v42 = vpack.c.bf16 %v2621_v40, %v2620_v23 }
0x1415   :  { %3129 = vmatmul.mubr.msk.f32.vlgmr.msra.gmra.mrb[22].mxu0 %vm199_vm4, %v2352_v46 }
0x1416   :  { %3158 = vmatprep.mubr.msk.f32.mxu0 %vm3397_vm5, %v3396_v22  ;;  %v3253_v22 = vpack.c.bf16 %v2814_v54, %v2813_v53  ;;  %3267 = vmatpush3.bf16.msra.mxu0 %v3266_v38  ;;  %v2825_v54 = vld [vmem:[%s4033_s17 + $0x1] ss:$0 sm:$0xff]  ;;  %s3404_s17 = smov [#allocation2]  }
0x1417   :  { %3268 = vmatprep.subr.bf16.mxu0 %v3403_v41  ;;  %s2710_s0 = sshll.u32 %s3404_s17, 4  ;;  %s2711_s0 = int_to_ptr.vmem [resolvable:$true] %s2710_s0 }
0x1418   :  { %3254 = vmatprep.subr.bf16.mxu1 %v3253_v22  ;;  %s3347_s4 = scalar_lea.vmem %s2711_s0, 256  ;;  %p3352_p1 = scmp.lt.s32.totalorder %s2711_s0, %s2711_s0 }
0x1419   :  { %3256 = vmatpush3.bf16.msra.mxu1 %v3253_v22  ;;  %p3348_p0 = scmp.ne.s32.totalorder %s2711_s0, %s3347_s4  ;;  %p3353_p2 = scmp.lt.s32.totalorder %s3347_s4, %s3347_s4 }
0x141a   :  { %3258 = vmatprep.subr.bf16.mxu1 %v3257_v57  ;;  %3270 = vmatpush3.bf16.msra.mxu0 %v3269_v42 }
0x141b   :  { %p3354_p3 = por %p3353_p2, %p3352_p1 }
0x141d   :  { %3260 = vmatpush3.bf16.msra.mxu1 %v3257_v57  ;;  %v2826_v57 = vld [vmem:[%s4034_s18 + $0x1] ss:$0 sm:$0xff]  ;;  %p3355_p4 = pnand %p3354_p3, %p3348_p0 }
0x141e   :  { %3262 = vmatprep.subr.bf16.mxu1 %v3261_v60 }
0x1421   :  { %3264 = vmatpush3.bf16.msra.mxu1 %v3261_v60 }
0x14e8   :  { %v3130_v62 = vpop.f32.mrb[22].mxu0 }
0x14e9   :  { %v2444_v63 = vadd.f32 %v3130_v62, %v2808_v61  ;;  %v2438_v0 = vpop.f32.mrb[23].mxu0 }
0x14ea   :  { %v2439_v1 = vadd.f32 %v2808_v61, %v2438_v0 }
0x14eb   :  { %v2448_v2 = vmul.f32 %v2444_v63, %v2444_v63 }
0x14ec   :  { %v2447_v3 = vmul.f32 %v2439_v1, %v2439_v1 }
0x14ed   :  { %v2450_v5 = vmul.f32 %v2448_v2, %v2444_v63 }
0x14ee   :  { %v2449_v7 = vmul.f32 %v2447_v3, %v2439_v1 }
0x14ef   :  { %v2452_v8 = vmul.f32 0.044715, %v2450_v5 }
0x14f0   :  { %v2451_v6 = vmul.f32 0.044715, %v2449_v7 }
0x14f1   :  { %v2454_v4 = vadd.f32 %v2452_v8, %v2444_v63 }
0x14f2   :  { %v2453_v9 = vadd.f32 %v2451_v6, %v2439_v1 }
0x14f3   :  { %v2456_v10 = vmul.f32 0.7978846, %v2454_v4 }
0x14f4   :  { %v2455_v14 = vmul.f32 0.7978846, %v2453_v9 }
0x14f5   :  { %3337 = vtanh.f32 %v2456_v10 }
0x14f6   :  { %3339 = vtanh.f32 %v2455_v14 }
0x14ff   :  { %v3338_v39 = vpop.eup %3337 }
0x1500   :  { %v3340_v15 = vpop.eup %3339  ;;  %v2460_v16 = vadd.f32 1.0, %v3338_v39 }
0x1501   :  { %v2459_v34 = vadd.f32 1.0, %v3340_v15 }
0x1502   :  { %v2462_v17 = vmul.f32 0.5, %v2460_v16 }
0x1503   :  { %v2461_v18 = vmul.f32 0.5, %v2459_v34 }
0x1504   :  { %v2464_v20 = vmul.f32 %v2462_v17, %v2444_v63 }
0x1505   :  { %v2463_v19 = vmul.f32 %v2461_v18, %v2439_v1 }
0x1507   :  { %3147 = vmatprep.mubr.msk.f32.mxu1 %vm1321_vm9, %v2463_v19 }
0x1508   :  { %3148 = vmatmul.mubr.msk.f32.vlgmr.msra.gmra.mrb[24].mxu1 %vm1321_vm9, %v2464_v20 }
0x15db   :  { %v3149_v24 = vpop.f32.mrb[24].mxu1 }
0x15dc   :  { %v2560_v45 = vadd.f32 %v3149_v24, %v2820_v21  ;;  %v2554_v50 = vpop.f32.mrb[25].mxu1 }
0x15dd   :  { %v2555_v12 = vadd.f32 %v2820_v21, %v2554_v50 }
0x15de   :  { %v2564_v25 = vadd.f32 %v2560_v45, %v2352_v46 }
0x15df   :  { %v2563_v51 = vadd.f32 %v2555_v12, %v2351_v43 }
0x15e0   :  { %v2572_v49 = vsel %vm199_vm4, %v2564_v25, 0.0 }
0x15e1   :  { %2573 = vadd.xlane.f32.xlu1 %v2572_v49  ;;  %v2569_v26 = vsel %vm199_vm4, %v2563_v51, 0.0 }
0x15e2   :  { %2570 = vadd.xlane.f32.xlu0 %v2569_v26 }
0x166e   :  { %v2574_v13 = vpop.xlane.xlu1 %2573 }
0x166f   :  { %v2576_v11 = vmul.f32 0.03125, %v2574_v13  ;;  %v2571_v27 = vpop.xlane.xlu0 %2570 }
0x1670   :  { %v2575_v28 = vmul.f32 0.03125, %v2571_v27 }
0x1671   :  { %v2578_v29 = vsub.f32 %v2564_v25, %v2576_v11 }
0x1672   :  { %v2577_v30 = vsub.f32 %v2563_v51, %v2575_v28 }
0x1673   :  { %v2580_v31 = vmul.f32 %v2578_v29, %v2578_v29 }
0x1674   :  { %v2579_v32 = vmul.f32 %v2577_v30, %v2577_v30 }
0x1675   :  { %v2584_v33 = vsel %vm199_vm4, %v2580_v31, 0.0 }
0x1676   :  { %2585 = vadd.xlane.f32.xlu1 %v2584_v33  ;;  %v2581_v35 = vsel %vm199_vm4, %v2579_v32, 0.0 }
0x1677   :  { %2582 = vadd.xlane.f32.xlu0 %v2581_v35 }
0x1703   :  { %v2586_v43 = vpop.xlane.xlu1 %2585 }
0x1704   :  { %v2588_v44 = vmul.f32 0.03125, %v2586_v43  ;;  %v2583_v46 = vpop.xlane.xlu0 %2582 }
0x1705   :  { %v2587_v47 = vmul.f32 0.03125, %v2583_v46 }
0x1706   :  { %v2590_v48 = vadd.f32 1e-12, %v2588_v44 }
0x1707   :  { %v2589_v52 = vadd.f32 1e-12, %v2587_v47 }
0x1708   :  { %3341 = vrsqrt.f32 %v2590_v48 }
0x1709   :  { %3343 = vrsqrt.f32 %v2589_v52 }
0x1712   :  { %v3342_v53 = vpop.eup %3341 }
0x1713   :  { %v3344_v22 = vpop.eup %3343  ;;  %v2594_v55 = vmul.f32 %v3342_v53, %v2578_v29 }
0x1714   :  { %v2593_v56 = vmul.f32 %v3344_v22, %v2577_v30 }
0x1715   :  { %v2602_v58 = vmul.f32 %v2825_v54, %v2594_v55 }
0x1716   :  { %v2601_v59 = vmul.f32 %v2825_v54, %v2593_v56 }
0x1717   :  { %v2610_v60 = vadd.f32 %v2826_v57, %v2602_v58 }
0x1718   :  { %v2609_v61 = vadd.f32 %v2826_v57, %v2601_v59 }
0x1719   :  { %v2614_v62 = vrot.slane %v2610_v60, 7  ;;  %2612 = vst.msk [vmem:[#allocation2 + $0x8] sm:$0xff] %vm199_vm4, %v2610_v60 }
0x171a   :  { %2611 = vst.msk [vmem:[#allocation2] sm:$0xff] %vm199_vm4, %v2609_v61 }
0x171b   :  { %v2617_v63 = vsel %vm2616_vm10, %v2609_v61, %v2614_v62 }
0x171c   :  { %3159 = vmatmul.mubr.msk.f32.vlgmr.msra.gmra.mrb[24].mxu0 %vm199_vm4, %v2617_v63 }
0x171d   :  { %3358 = shalt.err (!%p3355_p4)
}
0x171e   :  { %s3359_s23 = scalar_lea.hbm %s4037_s21, 256 }
0x171f   :  { %p3360_p5 = scmp.ne.s32.totalorder %s4037_s21, %s3359_s23  ;;  %p3363_p6 = scmp.lt.u32.totalorder %s3359_s23, %s4037_s21 }
0x1721   :  { %p3365_p7 = pnand %p3363_p6, %p3360_p5 }
0x1723   :  { %3368 = shalt.err (!%p3365_p7)
}
0x1724   :  { %s3405_s5 = smov 128   ;;  %s3406_s7 = smov 8   ;;  %v2827_v0 = vld [vmem:[%s4036_s20] ss:$0 sm:$0xff]  ;;  %vm2703_vm11 = vcmask 254976  }
0x1725   :  { %2716 = dma.vmem_to_hbm [thread:$0]  %s2711_s0, 256, %s4037_s21, [#allocation3], %s3405_s5, %s3405_s5, %s3406_s7  }
0x1726   :  { %s3407_s16 = smov [#allocation4]  }
0x1727   :  { %s2723_s27 = sshll.u32 %s3407_s16, 4  ;;  %s2724_s27 = int_to_ptr.vmem [resolvable:$true] %s2723_s27 }
0x1728   :  { %s3369_s8 = scalar_lea.vmem %s2724_s27, 32  ;;  %p3374_p9 = scmp.lt.s32.totalorder %s2724_s27, %s2724_s27 }
0x1729   :  { %p3370_p8 = scmp.ne.s32.totalorder %s2724_s27, %s3369_s8  ;;  %p3375_p10 = scmp.lt.s32.totalorder %s3369_s8, %s3369_s8 }
0x172b   :  { %p3376_p11 = por %p3375_p10, %p3374_p9 }
0x172d   :  { %p3377_p12 = pnand %p3376_p11, %p3370_p8 }
0x17ef   :  { %v2698_v1 = vpop.f32.mrb[24].mxu0 }
0x17f0   :  { %v2699_v2 = vadd.f32 %v2827_v0, %v2698_v1  ;;  %v3160_v3 = vpop.f32.mrb[25].mxu0 }
0x17f2   :  { %3345 = vtanh.f32 %v2699_v2 }
0x17fc   :  { %v3346_v5 = vpop.eup %3345 }
0x17fd   :  { %2704 = vst.msk [vmem:[#allocation4] sm:$0x3] %vm2703_vm11, %v3346_v5 }
0x17fe   :  { %3380 = shalt.err (!%p3377_p12)
}
0x17ff   :  { %s3381_s20 = scalar_lea.hbm %s4038_s22, 32 }
0x1800   :  { %p3382_p13 = scmp.ne.s32.totalorder %s4038_s22, %s3381_s20  ;;  %p3385_p0 = scmp.lt.u32.totalorder %s3381_s20, %s4038_s22 }
0x1802   :  { %p3387_p1 = pnand %p3385_p0, %p3382_p13 }
0x1804   :  { %3390 = shalt.err (!%p3387_p1)
}
0x1805   :  { %2726 = dma.vmem_to_hbm [thread:$0]  %s2724_s27, 32, %s4038_s22, [#allocation5]  }
0x1806   :  { %3391 = dma.done.wait [#allocation3], 256  }
0x1807   :  { %3392 = vsyncadd [#allocation3], 4294967040 }
0x1808   :  { %3393 = dma.done.wait [#allocation5], 32  }
0x1809   :  { %3394 = vsyncadd [#allocation5], 4294967264 }
0x180a   :  { %2733 = vsyncpa [#allocation3], 1 }
0x180b   :  { %2734 = vsyncpa [#allocation5], 1 }

</bundles_post_ra>
